<compile_context>
chip_gen: v7x
topology: tpu7x:2x2x1
jax: 0.10.0
libtpu: 0.0.40
codegen_flags: <defaults>
</compile_context>

<pallas_src>
import jax
import jax.numpy as jnp
import numpy as np
from jax.experimental import pallas as pl
from jax.experimental.pallas import tpu as pltpu


# ------------------------------- fused kernel ------------------------------- #

def bottleneck_kernel(x_ref, w1_ref, b1_ref, w2_ref, b2_ref, w3_ref, b3_ref,
                      o_ref):
    """Fused bottleneck: 1x1 conv -> 3x3 conv (pad 1, im2col) -> 1x1 conv,
    BN-bias + ReLU each (scales pre-folded into weights), residual add from the
    input block. All intermediates stay on-chip."""
    TB, H, W, Cin = x_ref.shape
    P = w1_ref.shape[1]          # planes
    Cout = w3_ref.shape[1]       # planes * 4 (== Cin, downsample=None)
    M = TB * H * W

    # Read the input block once; it feeds both conv1 and the residual add.
    x = x_ref[...]                               # (TB, H, W, Cin), bf16
    x2d = x.reshape(M, Cin)                      # lane dim unchanged -> cheap

    # ---- conv1 (1x1x1, bn1 scale folded into w1) + bias + relu ----
    y1 = jnp.dot(x2d, w1_ref[...], preferred_element_type=jnp.float32)
    y1 = jnp.maximum(y1 + b1_ref[...], 0.0)
    # TODO(synk): y1 is quantized to bf16 here so it can feed the MXU as a
    # bf16 operand; accumulation stays f32.
    y1 = y1.reshape(TB, H, W, P).astype(x.dtype)

    # ---- conv2 (1,3,3), stride 1, pad (0,1,1) as ONE im2col matmul ----
    # Zero-pad H and W with value concatenation (no scratch-ref round trip,
    # no per-step full-buffer zeroing).
    zc = jnp.zeros((TB, H, 1, P), y1.dtype)
    yp = jnp.concatenate([zc, y1, zc], axis=2)          # (TB, H, W+2, P)
    zr = jnp.zeros((TB, 1, W + 2, P), y1.dtype)
    yp = jnp.concatenate([zr, yp, zr], axis=1)          # (TB, H+2, W+2, P)

    # Build the (M, 9*P) operand: taps ordered (dy, dx) row-major to match the
    # wrapper's w2.reshape(9*P, P) flattening. One wide-K matmul fills the MXU.
    taps = [yp[:, dy:dy + H, dx:dx + W, :]
            for dy in range(3) for dx in range(3)]
    col = jnp.concatenate(taps, axis=-1).reshape(M, 9 * P)   # lane-dense K=9P
    y2 = jnp.dot(col, w2_ref[...], preferred_element_type=jnp.float32)
    y2 = jnp.maximum(y2 + b2_ref[...], 0.0)

    # ---- conv3 (1x1x1, bn3 scale folded into w3) + bias + residual + relu ----
    y3 = jnp.dot(y2.astype(x.dtype), w3_ref[...],
                 preferred_element_type=jnp.float32)
    y3 = y3 + b3_ref[...]
    y3 = jnp.maximum(y3 + x2d.astype(jnp.float32), 0.0)

    o_ref[...] = y3.reshape(TB, H, W, Cout).astype(o_ref.dtype)


# ------------------------------ pallas_call glue ----------------------------- #

def _full_spec(shape):
    n = len(shape)
    return pl.BlockSpec(shape, lambda b, _n=n: (0,) * _n)


def _vmem_capacity_bytes():
    """Physical VMEM of the local chip; conservative fallback if unavailable."""
    try:
        return int(pltpu.get_tpu_info().vmem_capacity_bytes)
    except Exception:
        return 64 * 1024 * 1024


def _vmem_per_frame_bytes(H, W, cin, planes, cout, act_bytes=2):
    """Per-frame VMEM estimate (corrected accounting: includes the residual f32
    upcast, the im2col operand and the padded copy)."""
    P = planes
    f32 = 4
    hw = H * W
    total = (
        2 * act_bytes * hw * cin                 # bf16 input block, double-buffered
        + 2 * act_bytes * hw * cout              # bf16 output block, double-buffered
        + f32 * hw * P                           # conv1 f32 accumulator
        + act_bytes * hw * P                     # y1 bf16
        + act_bytes * (H + 2) * (W + 2) * P      # zero-padded copy
        + act_bytes * hw * 9 * P                 # im2col operand (lane-dense K)
        + f32 * hw * P + act_bytes * hw * P      # conv2 acc + bf16 y2
        + f32 * hw * cout                        # conv3 f32 accumulator
        + f32 * hw * cin                         # residual f32 upcast
    )
    return total


def _choose_tb(B, per_frame_bytes, weight_bytes, vmem_cap):
    """Frames per grid step: largest divisor of B fitting a generation-aware
    VMEM budget. On ~64 MiB-VMEM chips (v7x, 2 TensorCores) prefer >= 2 grid
    steps so both cores get work; on 128 MiB single-TC chips (v5e/v6e) bigger
    tiles are strictly better."""
    budget = max(int(vmem_cap * 0.6) - weight_bytes, per_frame_bytes)
    per_frame = int(per_frame_bytes * 1.25)      # headroom: relayouts, compiler scratch
    cap_tb = max(1, budget // max(per_frame, 1))

    divs = []
    for d in range(1, B + 1):
        if d > cap_tb:
            break
        if B % d == 0:
            divs.append(d)
    if not divs:
        divs = [1]

    prefer_two_steps = vmem_cap <= 96 * 1024 * 1024   # proxy for v7x dual-TC
    if prefer_two_steps:
        multi = [d for d in divs if B // d >= 2]
        if multi:
            divs = multi
    return max(divs)


def fold_bn(gamma, beta, mean, var, eps=1e-5):
    scale = gamma.astype(jnp.float32) / jnp.sqrt(var.astype(jnp.float32) + eps)
    bias = beta.astype(jnp.float32) - mean.astype(jnp.float32) * scale
    return scale, bias


def bottleneck_forward(x_ncdhw, w1, bn1, w2, bn2, w3, bn3, *, stride=1,
                       eps=1e-5, compute_dtype=jnp.bfloat16):
    if stride != 1:
        # TODO(synk): stride>1 / downsample branch not implemented (module
        # defaults are stride=1, downsample=None; residual requires Cout==Cin).
        raise NotImplementedError("Only stride=1, downsample=None is supported.")

    N, C, T, H, W = x_ncdhw.shape
    P = w1.shape[1]
    Cout = w3.shape[1]
    assert Cout == C, "residual add without downsample requires inplanes == planes*4"
    B = N * T

    # TODO(synk): in a full network keep activations channels-last across layers
    # so these two full-tensor HBM transposes drop out of the hot path.
    x = jnp.transpose(x_ncdhw, (0, 2, 3, 4, 1)).reshape(B, H, W, C)
    x = x.astype(compute_dtype)

    # Fold BN scales into conv weights (f32), keep only bias + ReLU in-kernel.
    s1, b1 = fold_bn(*bn1, eps)
    s2, b2 = fold_bn(*bn2, eps)
    s3, b3 = fold_bn(*bn3, eps)
    w1f = (w1.astype(jnp.float32) * s1[None, :]).astype(compute_dtype)
    w2f = (w2.astype(jnp.float32) * s2[None, None, None, :]
           ).reshape(9 * P, P).astype(compute_dtype)          # (dy,dx,cin)-major rows
    w3f = (w3.astype(jnp.float32) * s3[None, :]).astype(compute_dtype)
    b1 = b1.reshape(1, P)
    b2 = b2.reshape(1, P)
    b3 = b3.reshape(1, Cout)

    vmem_cap = _vmem_capacity_bytes()
    per_frame = _vmem_per_frame_bytes(H, W, C, P, Cout)
    weight_bytes = 2 * (2 * (w1f.size + w2f.size + w3f.size)
                        + 4 * (b1.size + b2.size + b3.size))
    TB = _choose_tb(B, per_frame, weight_bytes, vmem_cap)
    grid = (B // TB,)
    vmem_limit = int(max(32 * 1024 * 1024,
                         min(int(vmem_cap * 0.7), 96 * 1024 * 1024)))

    out = pl.pallas_call(
        bottleneck_kernel,
        out_shape=jax.ShapeDtypeStruct((B, H, W, Cout), compute_dtype),
        grid=grid,
        in_specs=[
            pl.BlockSpec((TB, H, W, C), lambda b: (b, 0, 0, 0)),
            _full_spec(w1f.shape), _full_spec(b1.shape),
            _full_spec(w2f.shape), _full_spec(b2.shape),
            _full_spec(w3f.shape), _full_spec(b3.shape),
        ],
        out_specs=pl.BlockSpec((TB, H, W, Cout), lambda b: (b, 0, 0, 0)),
        compiler_params=pltpu.CompilerParams(
            dimension_semantics=("parallel",),
            vmem_limit_bytes=vmem_limit),
    )(x, w1f, b1, w2f, b2, w3f, b3)

    return jnp.transpose(out.reshape(N, T, H, W, Cout), (0, 4, 1, 2, 3))


# ------------------------------ pure-JAX reference ---------------------------- #

def bottleneck_reference(x_ncdhw, w1, bn1, w2, bn2, w3, bn3, *, eps=1e-5):
    N, C, T, H, W = x_ncdhw.shape
    x = jnp.transpose(x_ncdhw, (0, 2, 3, 4, 1)).reshape(N * T, H, W, C)
    x = x.astype(jnp.float32)
    w1 = w1.astype(jnp.float32)
    w2 = w2.astype(jnp.float32)
    w3 = w3.astype(jnp.float32)

    def bn(y, p):
        g, b, m, v = p
        return (y - m) / jnp.sqrt(v + eps) * g + b

    hp = jax.lax.Precision.HIGHEST
    y = jnp.einsum("bhwc,co->bhwo", x, w1, precision=hp)
    y = jax.nn.relu(bn(y, bn1))
    y = jax.lax.conv_general_dilated(y, w2, window_strides=(1, 1),
                                     padding=((1, 1), (1, 1)),
                                     dimension_numbers=("NHWC", "HWIO", "NHWC"),
                                     precision=hp)
    y = jax.nn.relu(bn(y, bn2))
    y = jnp.einsum("bhwc,co->bhwo", y, w3, precision=hp)
    y = jax.nn.relu(bn(y, bn3) + x)
    return jnp.transpose(y.reshape(N, T, H, W, -1), (0, 4, 1, 2, 3))


# ------------------------------------ main ----------------------------------- #

if __name__ == "__main__":
    key = jax.random.PRNGKey(0)
    ks = jax.random.split(key, 8)

    N, T, H, W = 2, 3, 8, 8
    planes = 32
    inplanes = planes * 4      # residual adds directly (downsample=None)

    x_ncdhw = jax.random.normal(ks[0], (N, inplanes, T, H, W), jnp.float32)

    # Channels-last weights:
    #   conv1: Conv3d(inplanes, planes, 1)      -> (Cin, Cout)
    #   conv2: Conv3d(planes, planes, (1,3,3))  -> (kh, kw, Cin, Cout)
    #   conv3: Conv3d(planes, planes*4, 1)      -> (Cin, Cout)
    w1 = 0.1 * jax.random.normal(ks[1], (inplanes, planes), jnp.float32)
    w2 = 0.1 * jax.random.normal(ks[2], (3, 3, planes, planes), jnp.float32)
    w3 = 0.1 * jax.random.normal(ks[3], (planes, planes * 4), jnp.float32)

    def bn_params(k, c):
        k1, k2, k3, k4 = jax.random.split(k, 4)
        gamma = 1.0 + 0.1 * jax.random.normal(k1, (c,), jnp.float32)
        beta = 0.1 * jax.random.normal(k2, (c,), jnp.float32)
        mean = 0.1 * jax.random.normal(k3, (c,), jnp.float32)
        var = jax.nn.softplus(jax.random.normal(k4, (c,), jnp.float32)) + 0.5
        return gamma, beta, mean, var

    bn1 = bn_params(ks[4], planes)
    bn2 = bn_params(ks[5], planes)
    bn3 = bn_params(ks[6], planes * 4)

    # bf16 activations/weights feed both kernel and reference; the kernel does
    # bf16 matmuls with f32 accumulation (BN scales folded into bf16 weights),
    # the reference computes fully in f32.
    x_bf = x_ncdhw.astype(jnp.bfloat16)
    w1_bf = w1.astype(jnp.bfloat16)
    w2_bf = w2.astype(jnp.bfloat16)
    w3_bf = w3.astype(jnp.bfloat16)

    out = bottleneck_forward(x_bf, w1_bf, bn1, w2_bf, bn2, w3_bf, bn3)
    out = jax.block_until_ready(out)

    ref = bottleneck_reference(x_bf, w1_bf, bn1, w2_bf, bn2, w3_bf, bn3)
    assert out.shape == (N, planes * 4, T, H, W)
    np.testing.assert_allclose(np.asarray(out.astype(jnp.float32)),
                               np.asarray(ref), rtol=3e-2, atol=3e-2)

    print("KERNEL_OK")
</pallas_src>

<mosaic_0001>
module attributes {stable_mosaic.version = 11 : i64} {
  func.func @bottleneck_kernel(%arg0: i32, %arg1: memref<3x8x8x128xbf16, #tpu.memory_space<vmem>>, %arg2: memref<128x32xbf16, #tpu.memory_space<vmem>>, %arg3: memref<1x32xf32, #tpu.memory_space<vmem>>, %arg4: memref<288x32xbf16, #tpu.memory_space<vmem>>, %arg5: memref<1x32xf32, #tpu.memory_space<vmem>>, %arg6: memref<32x128xbf16, #tpu.memory_space<vmem>>, %arg7: memref<1x128xf32, #tpu.memory_space<vmem>>, %arg8: memref<3x8x8x128xbf16, #tpu.memory_space<vmem>>) attributes {dimension_semantics = [#tpu.dimension_semantics<parallel>], iteration_bounds = array<i64: 2>, scalar_prefetch = 0 : i64, scratch_operands = 0 : i64, tpu.core_type = #tpu.core_type<tc>, window_params = [{transform_indices = @transform_0, window_bounds = array<i64: 3, 8, 8, 128>}, {pipeline_mode = #tpu.pipeline_mode<synchronous>, transform_indices = @transform_1, window_bounds = array<i64: 128, 32>}, {pipeline_mode = #tpu.pipeline_mode<synchronous>, transform_indices = @transform_2, window_bounds = array<i64: 1, 32>}, {pipeline_mode = #tpu.pipeline_mode<synchronous>, transform_indices = @transform_3, window_bounds = array<i64: 288, 32>}, {pipeline_mode = #tpu.pipeline_mode<synchronous>, transform_indices = @transform_4, window_bounds = array<i64: 1, 32>}, {pipeline_mode = #tpu.pipeline_mode<synchronous>, transform_indices = @transform_5, window_bounds = array<i64: 32, 128>}, {pipeline_mode = #tpu.pipeline_mode<synchronous>, transform_indices = @transform_6, window_bounds = array<i64: 1, 128>}, {transform_indices = @transform_7, window_bounds = array<i64: 3, 8, 8, 128>}]} {
    %c0 = arith.constant 0 : index
    %c0_0 = arith.constant 0 : index
    %c0_1 = arith.constant 0 : index
    %c0_2 = arith.constant 0 : index
    %0 = vector.load %arg1[%c0, %c0_0, %c0_1, %c0_2] : memref<3x8x8x128xbf16, #tpu.memory_space<vmem>>, vector<3x8x8x128xbf16>
    %1 = vector.shape_cast %0 : vector<3x8x8x128xbf16> to vector<192x128xbf16>
    %c0_3 = arith.constant 0 : index
    %c0_4 = arith.constant 0 : index
    %2 = vector.load %arg2[%c0_3, %c0_4] : memref<128x32xbf16, #tpu.memory_space<vmem>>, vector<128x32xbf16>
    %cst = arith.constant dense<0.000000e+00> : vector<192x32xf32>
    %3 = tpu.matmul %1, %2, %cst {dimension_numbers = #tpu.dot_dimension_numbers<[1], [0], [0], [1], [0, 0, 1, 1], [], []>} : vector<192x128xbf16>, vector<128x32xbf16>, vector<192x32xf32> -> vector<192x32xf32>
    %c0_5 = arith.constant 0 : index
    %c0_6 = arith.constant 0 : index
    %4 = vector.load %arg3[%c0_5, %c0_6] : memref<1x32xf32, #tpu.memory_space<vmem>>, vector<1x32xf32>
    %5 = vector.broadcast %4 : vector<1x32xf32> to vector<192x32xf32>
    %6 = arith.addf %3, %5 : vector<192x32xf32>
    %cst_7 = arith.constant 0.000000e+00 : f32
    %7 = vector.broadcast %cst_7 : f32 to vector<192x32xf32>
    %8 = arith.maximumf %6, %7 : vector<192x32xf32>
    %9 = vector.shape_cast %8 : vector<192x32xf32> to vector<3x8x8x32xf32>
    %10 = arith.truncf %9 : vector<3x8x8x32xf32> to vector<3x8x8x32xbf16>
    %cst_8 = arith.constant 0.000000e+00 : bf16
    %11 = vector.broadcast %cst_8 : bf16 to vector<3x8x1x32xbf16>
    %12 = tpu.concatenate %11, %10, %11 in 2 : vector<3x8x1x32xbf16>, vector<3x8x8x32xbf16>, vector<3x8x1x32xbf16> -> vector<3x8x10x32xbf16>
    %cst_9 = arith.constant 0.000000e+00 : bf16
    %13 = vector.broadcast %cst_9 : bf16 to vector<3x1x10x32xbf16>
    %14 = tpu.concatenate %13, %12, %13 in 1 : vector<3x1x10x32xbf16>, vector<3x8x10x32xbf16>, vector<3x1x10x32xbf16> -> vector<3x10x10x32xbf16>
    %15 = vector.extract_strided_slice %14 {offsets = [0, 0, 0, 0], sizes = [3, 8, 8, 32], strides = [1, 1, 1, 1]} : vector<3x10x10x32xbf16> to vector<3x8x8x32xbf16>
    %16 = vector.extract_strided_slice %14 {offsets = [0, 0, 1, 0], sizes = [3, 8, 8, 32], strides = [1, 1, 1, 1]} : vector<3x10x10x32xbf16> to vector<3x8x8x32xbf16>
    %17 = vector.extract_strided_slice %14 {offsets = [0, 0, 2, 0], sizes = [3, 8, 8, 32], strides = [1, 1, 1, 1]} : vector<3x10x10x32xbf16> to vector<3x8x8x32xbf16>
    %18 = vector.extract_strided_slice %14 {offsets = [0, 1, 0, 0], sizes = [3, 8, 8, 32], strides = [1, 1, 1, 1]} : vector<3x10x10x32xbf16> to vector<3x8x8x32xbf16>
    %19 = vector.extract_strided_slice %14 {offsets = [0, 1, 1, 0], sizes = [3, 8, 8, 32], strides = [1, 1, 1, 1]} : vector<3x10x10x32xbf16> to vector<3x8x8x32xbf16>
    %20 = vector.extract_strided_slice %14 {offsets = [0, 1, 2, 0], sizes = [3, 8, 8, 32], strides = [1, 1, 1, 1]} : vector<3x10x10x32xbf16> to vector<3x8x8x32xbf16>
    %21 = vector.extract_strided_slice %14 {offsets = [0, 2, 0, 0], sizes = [3, 8, 8, 32], strides = [1, 1, 1, 1]} : vector<3x10x10x32xbf16> to vector<3x8x8x32xbf16>
    %22 = vector.extract_strided_slice %14 {offsets = [0, 2, 1, 0], sizes = [3, 8, 8, 32], strides = [1, 1, 1, 1]} : vector<3x10x10x32xbf16> to vector<3x8x8x32xbf16>
    %23 = vector.extract_strided_slice %14 {offsets = [0, 2, 2, 0], sizes = [3, 8, 8, 32], strides = [1, 1, 1, 1]} : vector<3x10x10x32xbf16> to vector<3x8x8x32xbf16>
    %24 = tpu.concatenate %15, %16, %17, %18, %19, %20, %21, %22, %23 in 3 : vector<3x8x8x32xbf16>, vector<3x8x8x32xbf16>, vector<3x8x8x32xbf16>, vector<3x8x8x32xbf16>, vector<3x8x8x32xbf16>, vector<3x8x8x32xbf16>, vector<3x8x8x32xbf16>, vector<3x8x8x32xbf16>, vector<3x8x8x32xbf16> -> vector<3x8x8x288xbf16>
    %25 = vector.shape_cast %24 : vector<3x8x8x288xbf16> to vector<192x288xbf16>
    %c0_10 = arith.constant 0 : index
    %c0_11 = arith.constant 0 : index
    %26 = vector.load %arg4[%c0_10, %c0_11] : memref<288x32xbf16, #tpu.memory_space<vmem>>, vector<288x32xbf16>
    %cst_12 = arith.constant dense<0.000000e+00> : vector<192x32xf32>
    %27 = tpu.matmul %25, %26, %cst_12 {dimension_numbers = #tpu.dot_dimension_numbers<[1], [0], [0], [1], [0, 0, 1, 1], [], []>} : vector<192x288xbf16>, vector<288x32xbf16>, vector<192x32xf32> -> vector<192x32xf32>
    %c0_13 = arith.constant 0 : index
    %c0_14 = arith.constant 0 : index
    %28 = vector.load %arg5[%c0_13, %c0_14] : memref<1x32xf32, #tpu.memory_space<vmem>>, vector<1x32xf32>
    %29 = vector.broadcast %28 : vector<1x32xf32> to vector<192x32xf32>
    %30 = arith.addf %27, %29 : vector<192x32xf32>
    %cst_15 = arith.constant 0.000000e+00 : f32
    %31 = vector.broadcast %cst_15 : f32 to vector<192x32xf32>
    %32 = arith.maximumf %30, %31 : vector<192x32xf32>
    %33 = arith.truncf %32 : vector<192x32xf32> to vector<192x32xbf16>
    %c0_16 = arith.constant 0 : index
    %c0_17 = arith.constant 0 : index
    %34 = vector.load %arg6[%c0_16, %c0_17] : memref<32x128xbf16, #tpu.memory_space<vmem>>, vector<32x128xbf16>
    %cst_18 = arith.constant dense<0.000000e+00> : vector<192x128xf32>
    %35 = tpu.matmul %33, %34, %cst_18 {dimension_numbers = #tpu.dot_dimension_numbers<[1], [0], [0], [1], [0, 0, 1, 1], [], []>} : vector<192x32xbf16>, vector<32x128xbf16>, vector<192x128xf32> -> vector<192x128xf32>
    %c0_19 = arith.constant 0 : index
    %c0_20 = arith.constant 0 : index
    %36 = vector.load %arg7[%c0_19, %c0_20] : memref<1x128xf32, #tpu.memory_space<vmem>>, vector<1x128xf32>
    %37 = vector.broadcast %36 : vector<1x128xf32> to vector<192x128xf32>
    %38 = arith.addf %35, %37 : vector<192x128xf32>
    %39 = arith.extf %1 : vector<192x128xbf16> to vector<192x128xf32>
    %40 = arith.addf %38, %39 : vector<192x128xf32>
    %cst_21 = arith.constant 0.000000e+00 : f32
    %41 = vector.broadcast %cst_21 : f32 to vector<192x128xf32>
    %42 = arith.maximumf %40, %41 : vector<192x128xf32>
    %43 = vector.shape_cast %42 : vector<192x128xf32> to vector<3x8x8x128xf32>
    %44 = arith.truncf %43 : vector<3x8x8x128xf32> to vector<3x8x8x128xbf16>
    %c0_22 = arith.constant 0 : index
    %c0_23 = arith.constant 0 : index
    %c0_24 = arith.constant 0 : index
    %c0_25 = arith.constant 0 : index
    %45 = vector.load %arg8[%c0_22, %c0_23, %c0_24, %c0_25] : memref<3x8x8x128xbf16, #tpu.memory_space<vmem>>, vector<3x8x8x128xbf16>
    tpu.vector_store %arg8[%c0_22, %c0_23, %c0_24, %c0_25], %44 {strides = array<i32>} : memref<3x8x8x128xbf16, #tpu.memory_space<vmem>>, vector<3x8x8x128xbf16>,
    return
  }
  func.func @transform_0(%arg0: i32) -> (i32, i32, i32, i32) {
    %c0_i32 = arith.constant 0 : i32
    %c0_i32_0 = arith.constant 0 : i32
    %c0_i32_1 = arith.constant 0 : i32
    %c0_i32_2 = arith.constant 0 : i32
    return %arg0, %c0_i32, %c0_i32_0, %c0_i32_1 : i32, i32, i32, i32
  }
  func.func @transform_1(%arg0: i32) -> (i32, i32) {
    %c0_i32 = arith.constant 0 : i32
    %c0_i32_0 = arith.constant 0 : i32
    %c0_i32_1 = arith.constant 0 : i32
    return %c0_i32, %c0_i32_0 : i32, i32
  }
  func.func @transform_2(%arg0: i32) -> (i32, i32) {
    %c0_i32 = arith.constant 0 : i32
    %c0_i32_0 = arith.constant 0 : i32
    %c0_i32_1 = arith.constant 0 : i32
    return %c0_i32, %c0_i32_0 : i32, i32
  }
  func.func @transform_3(%arg0: i32) -> (i32, i32) {
    %c0_i32 = arith.constant 0 : i32
    %c0_i32_0 = arith.constant 0 : i32
    %c0_i32_1 = arith.constant 0 : i32
    return %c0_i32, %c0_i32_0 : i32, i32
  }
  func.func @transform_4(%arg0: i32) -> (i32, i32) {
    %c0_i32 = arith.constant 0 : i32
    %c0_i32_0 = arith.constant 0 : i32
    %c0_i32_1 = arith.constant 0 : i32
    return %c0_i32, %c0_i32_0 : i32, i32
  }
  func.func @transform_5(%arg0: i32) -> (i32, i32) {
    %c0_i32 = arith.constant 0 : i32
    %c0_i32_0 = arith.constant 0 : i32
    %c0_i32_1 = arith.constant 0 : i32
    return %c0_i32, %c0_i32_0 : i32, i32
  }
  func.func @transform_6(%arg0: i32) -> (i32, i32) {
    %c0_i32 = arith.constant 0 : i32
    %c0_i32_0 = arith.constant 0 : i32
    %c0_i32_1 = arith.constant 0 : i32
    return %c0_i32, %c0_i32_0 : i32, i32
  }
  func.func @transform_7(%arg0: i32) -> (i32, i32, i32, i32) {
    %c0_i32 = arith.constant 0 : i32
    %c0_i32_0 = arith.constant 0 : i32
    %c0_i32_1 = arith.constant 0 : i32
    %c0_i32_2 = arith.constant 0 : i32
    return %arg0, %c0_i32, %c0_i32_0, %c0_i32_1 : i32, i32, i32, i32
  }
}

</mosaic_0001>

<bundles_post_ra>
// kernel: tpu_custom_call.1
= control target key start
LH: loop header
LB: loop body
LE: loop exit
PB: predicated region body
PF: predicated region fallthrough
CT: control target
= control target key end

     0   :  { %12 = vsyncpa [#allocation3], 0  ;;  %s4760_s0 = inlined_call_operand.vmem [shape: bf16[6,8,8,128], index: 0, kind: input, shape index: {}]   ;;  %s4761_s1 = inlined_call_operand.vmem [shape: bf16[128,32], index: 1, kind: input, shape index: {}]   ;;  %s4762_s2 = inlined_call_operand.vmem [shape: f32[1,32], index: 2, kind: input, shape index: {}]   ;;  %s4763_s3 = inlined_call_operand.vmem [shape: bf16[288,32], index: 3, kind: input, shape index: {}]   ;;  %s4764_s4 = inlined_call_operand.vmem [shape: f32[1,32], index: 4, kind: input, shape index: {}]   ;;  %s4765_s5 = inlined_call_operand.vmem [shape: bf16[32,128], index: 5, kind: input, shape index: {}]   ;;  %s4766_s6 = inlined_call_operand.vmem [shape: f32[1,128], index: 6, kind: input, shape index: {}]   ;;  %s4767_s7 = inlined_call_operand.hbm [shape: bf16[6,8,8,128], index: 7, kind: output, shape index: {}]  }
   0x1   :  { %14 = vsyncpa [#allocation3 + $0x1], 0  ;;  %s3367_s24 = smov 0   ;;  %s3369_s25 = smov 0  }
   0x2   :  { %s3371_s26 = smov 0   ;;  %s3373_s27 = smov 0  }
   0x3 LB: > { %s3388_s28 = sadd.s32 4294967295, %s3319_s27   ;;  %s2718_s29 = sadd.s32 4294967294, %s3319_s27   ;;  %s3319_s27 = sphi %s3373_s27, %s4866_s27   ;;  %s3315_s26 = sphi %s3371_s26, %s4865_s26   ;;  %s3311_s25 = sphi %s3369_s25, %s4864_s25   ;;  %s3307_s24 = sphi %s3367_s24, %s4863_s24  }
   0x4   : > { %s3392_s30 = sadd.s32 1, %s3319_s27   ;;  %s179_s8 = sadd.s32 1, %s3315_s26 }
   0x5   : > { %s176_s9 = ssub.s32 %s3319_s27, %s3392_s30  ;;  %p189_p0 = scmp.ne.s32.totalorder %s3315_s26, %s3311_s25 }
   0x6   : > { %p177_p1 = scmp.eq.s32.totalorder %s176_s9, 0  ;;  %p190_p2 = scmp.eq.s32.totalorder %s3388_s28, 1 }
   0x7   : > { %p195_p3 = scmp.ne.s32.totalorder %s3311_s25, %s3307_s24  ;;  %p196_p4 = scmp.eq.s32.totalorder %s2718_s29, 1 }
   0x8   : > { %s3403_s10 = scalar_select %p177_p1, %s3315_s26, %s179_s8  }
   0x9   : > { %p3405_p5 = por %p190_p2, %p189_p0  ;;  %p3409_p6 = por %p196_p4, %p195_p3 }
   0xa   : > { %p2721_p7 = scmp.ge.s32.totalorder %s3319_s27, 1  ;;  %p242_p8 = scmp.lt.s32.totalorder %s3319_s27, 3 }
   0xc   : > { %p243_p9 = pnand %p2721_p7, %p242_p8 }
   0xe   : > { %246 = sbr.rel (%p243_p9) target bundleno = 1143 (0x477), region = 48 }
  0x15   : > { %v3192_v0 = vld [vmem:[%s4761_s1] sm:$0xff]   ;;  %s275_s15 = smul.u32 3, %s3388_s28  ;;  %v3193_v1 = vld [vmem:[%s4761_s1 + $0x8] sm:$0xff]   ;;  %v3194_v2 = vld [vmem:[%s4761_s1 + $0x10] sm:$0xff]   ;;  %v3321_v20 = vmov 0   ;;  %s3323_s21 = smov 32  }
  0x16   : > { %3042 = vmatprep.subr.bf16.mxu0 %v3192_v0  ;;  %v3195_v3 = vld [vmem:[%s4761_s1 + $0x18] sm:$0xff]   ;;  %v3196_v5 = vld [vmem:[%s4761_s1 + $0x20] sm:$0xff]   ;;  %v3197_v6 = vld [vmem:[%s4761_s1 + $0x28] sm:$0xff]   ;;  %v3457_v21 = vrot.slane %v3321_v20, 1  ;;  %s3324_s22 = smov 96   ;;  %vm820_vm0 = vcmask 1040384  }
  0x17   : > { %p276_p10 = scmp.lt.s32.totalorder %s275_s15, 5  ;;  %3043 = vmatpush3.bf16.msra.mxu0 %v3192_v0  ;;  %v3198_v7 = vld [vmem:[%s4761_s1 + $0x30] sm:$0xff]   ;;  %v3199_v8 = vld [vmem:[%s4761_s1 + $0x38] sm:$0xff]   ;;  %v3468_v23 = vld [vmem:[%s4763_s3 + $0x80] sm:$0xff]   ;;  %vm821_vm1 = vsmask.f32 256 }
  0x18   : > { %3044 = vmatprep.subr.bf16.mxu0 %v3193_v1  ;;  %4793 = vst [vmem:[#allocation5_spill] sm:$0xff] %v3457_v21  ;;  %v3187_v22 = vpack.i.bf16 %v3321_v20, %v3457_v21  ;;  %1028 = vrot.lane.b32.xlu1 %v3457_v21, %s3323_s21  ;;  %v3475_v24 = vld [vmem:[%s4763_s3 + $0x88] sm:$0xff]   ;;  %v3482_v25 = vld [vmem:[%s4762_s2] ss:$0 sm:$0xff]  ;;  %vm847_vm2 = vcmask 1044480   ;;  %vm3490_vm4 = vmand %vm820_vm0, %vm821_vm1  ;;  %vm1371_vm6 = vcmask 261120  }
  0x19   : > { %s4868_s15 = smov (!%p276_p10, %s275_s15), 5  ;;  %vm848_vm3 = vsmask.f32 4352  ;;  %vm1416_vm7 = vcmask 523264   ;;  %vm1461_vm8 = vcmask 785408   ;;  %s272_s16 = sand.u32 1, %s3311_s25  }
  0x1a   : > { %s2831_s20 = sshll.u32 %s4868_s15, 5  ;;  %vm3497_vm5 = vmand %vm847_vm2, %vm848_vm3  ;;  %s3142_s17 = smul.u32 96, %s272_s16 }
  0x1b   : > { %3045 = vmatpush3.bf16.msra.mxu0 %v3193_v1  ;;  %s3428_s23 = scalar_lea.vmem %s4760_s0, %s2831_s20  ;;  %s3322_s20 = smov 64  }
  0x1c   : > { %3046 = vmatprep.subr.bf16.mxu0 %v3194_v2  ;;  %v284_v4 = vld [vmem:[%s3428_s23] sm:$0xff]   ;;  %v286_v9 = vld [vmem:[%s3428_s23 + $0x8] sm:$0xff]   ;;  %v288_v10 = vld [vmem:[%s3428_s23 + $0x10] sm:$0xff]   ;;  %3188 = vrot.lane.b32.xlu0 %v3187_v22, %s3322_s20  ;;  %s4662_s18 = scalar_lea.vmem [#allocation2], %s3142_s17  ;;  %s3325_s9 = smov [#allocation2]  }
  0x1d   : > { %3058 = vmatprep.mubr.bf16.mxu0 %v284_v4  ;;  %v290_v11 = vld [vmem:[%s3428_s23 + $0x18] sm:$0xff]   ;;  %v292_v12 = vld [vmem:[%s3428_s23 + $0x20] sm:$0xff]   ;;  %v294_v13 = vld [vmem:[%s3428_s23 + $0x28] sm:$0xff]   ;;  %s2656_s19 = sshll.u32 %s4662_s18, 4  ;;  %s3261_s13 = sshll.u32 %s3325_s9, 4  ;;  %s4706_s19 = int_to_ptr.vmem [resolvable:$true] %s2656_s19  ;;  %s3262_s13 = int_to_ptr.vmem [resolvable:$false] %s3261_s13 }
  0x1e   : > { %v296_v14 = vld [vmem:[%s3428_s23 + $0x30] sm:$0xff]   ;;  %v298_v15 = vld [vmem:[%s3428_s23 + $0x38] sm:$0xff]   ;;  %v300_v16 = vld [vmem:[%s3428_s23 + $0x40] sm:$0xff]   ;;  %s3257_s8 = scalar_lea.vmem %s4706_s19, 1536  ;;  %s3263_s14 = scalar_lea.vmem %s3262_s13, 3072 }
  0x1f   : > { %3047 = vmatpush3.bf16.msra.mxu0 %v3194_v2  ;;  %v302_v17 = vld [vmem:[%s3428_s23 + $0x48] sm:$0xff]   ;;  %v304_v18 = vld [vmem:[%s3428_s23 + $0x50] sm:$0xff]   ;;  %v306_v19 = vld [vmem:[%s3428_s23 + $0x58] sm:$0xff]   ;;  %p3258_p11 = scmp.ne.s32.totalorder %s4706_s19, %s3257_s8  ;;  %p3264_p0 = scmp.lt.s32.totalorder %s4706_s19, %s3262_s13 }
  0x20   : > { %3048 = vmatprep.subr.bf16.mxu0 %v3195_v3  ;;  %1341 = vrot.lane.b32.xlu0 %v3457_v21, %s3324_s22  ;;  %p3265_p1 = scmp.lt.s32.totalorder %s3263_s14, %s3257_s8 }
  0x21   : > { %p3259_p12 = pnand %p3258_p11, %p3405_p5 }
  0x22   : > { %p3266_p2 = por %p3265_p1, %p3264_p0 }
  0x23   : > { %3049 = vmatpush3.bf16.msra.mxu0 %v3195_v3  ;;  %p3260_p13 = pneg %p3259_p12 }
  0x24   : > { %3050 = vmatprep.subr.bf16.mxu0 %v3196_v5 }
  0x25   : > { %p3267_p3 = pnand %p3266_p2, %p3260_p13 }
  0x27   : > { %3051 = vmatpush3.bf16.msra.mxu0 %v3196_v5 }
  0x28   : > { %3052 = vmatprep.subr.bf16.mxu0 %v3197_v6 }
  0x2b   : > { %3053 = vmatpush3.bf16.msra.mxu0 %v3197_v6 }
  0x2c   : > { %3054 = vmatprep.subr.bf16.mxu0 %v3198_v7 }
  0x2f   : > { %3055 = vmatpush3.bf16.msra.mxu0 %v3198_v7 }
  0x30   : > { %3056 = vmatprep.subr.bf16.mxu0 %v3199_v8 }
  0x33   : > { %3057 = vmatpush3.bf16.msra.mxu0 %v3199_v8 }
  0x34   : > { %3082 = vmatprep.subr.bf16.mxu0 %v3468_v23 }
  0x36   : > { %3059 = vmatmul.mubr.bf16.vlgmr.msra.gmra.mrb[0].mxu0 %v286_v9 }
  0x37   : > { %3062 = vmatprep.mubr.bf16.mxu0 %v288_v10  ;;  %3083 = vmatpush3.bf16.msra.mxu0 %v3468_v23 }
  0x38   : > { %3084 = vmatprep.subr.bf16.mxu0 %v3475_v24 }
  0x3b   : > { %3085 = vmatpush3.bf16.msra.mxu0 %v3475_v24 }
  0x3e   : > { %3063 = vmatmul.mubr.bf16.gmra.mrb[4].mxu0 %v290_v11 }
  0x3f   : > { %3066 = vmatprep.mubr.bf16.mxu0 %v292_v12 }
  0x46   : > { %3067 = vmatmul.mubr.bf16.gmra.mrb[8].mxu0 %v294_v13 }
  0x47   : > { %3070 = vmatprep.mubr.bf16.mxu0 %v296_v14 }
  0x4e   : > { %3071 = vmatmul.mubr.bf16.gmra.mrb[12].mxu0 %v298_v15 }
  0x4f   : > { %3074 = vmatprep.mubr.bf16.mxu0 %v300_v16 }
  0x56   : > { %3075 = vmatmul.mubr.bf16.gmra.mrb[16].mxu0 %v302_v17 }
  0x57   : > { %3078 = vmatprep.mubr.bf16.mxu0 %v304_v18 }
  0x5e   : > { %3079 = vmatmul.mubr.bf16.gmra.mrb[20].mxu0 %v306_v19 }
 0x109   : > { %v3060_v26 = vpop.f32.mrb[0].mxu0 }
 0x10a   : > { %v494_v27 = vadd.f32 %v3060_v26, %v3482_v25  ;;  %v485_v28 = vpop.f32.mrb[1].mxu0 }
 0x10b   : > { %v486_v29 = vadd.f32 %v3482_v25, %v485_v28  ;;  %v3061_v30 = vpop.f32.mrb[2].mxu0 }
 0x10c   : > { %v582_v31 = vmax.f32 %v494_v27, 0.0  ;;  %v497_v32 = vadd.f32 %v3061_v30, %v3482_v25  ;;  %v488_v33 = vpop.f32.mrb[3].mxu0 }
 0x10d   : > { %v580_v34 = vmax.f32 %v486_v29, 0.0  ;;  %v489_v35 = vadd.f32 %v3482_v25, %v488_v33  ;;  %v3215_v33 = vld [vmem:[%s4763_s3] sm:$0xff]  }
 0x10e   : > { %v606_v36 = vpack.c.bf16 %v582_v31, %v582_v31  ;;  %v583_v37 = vmax.f32 %v497_v32, 0.0  ;;  %v3214_v32 = vld [vmem:[%s4763_s3 + $0x40] sm:$0xff]  }
 0x10f   : > { %v604_v38 = vpack.c.bf16 %v580_v34, %v580_v34  ;;  %v581_v39 = vmax.f32 %v489_v35, 0.0  ;;  %2926 = vmatprep.subr.bf16.mxu1 %v3214_v32 }
 0x110   : > { %v643_v40 = vshrl.u32 %v606_v36, 16  ;;  %v607_v41 = vpack.c.bf16 %v583_v37, %v583_v37  ;;  %v646_v42 = vshll.u32 %v606_v36, 16  ;;  %2927 = vmatpush3.bf16.msra.mxu1 %v3215_v33 }
 0x111   : > { %v629_v43 = vshrl.u32 %v604_v38, 16  ;;  %v605_v44 = vpack.c.bf16 %v581_v39, %v581_v39  ;;  %v3064_v45 = vpop.f32.mrb[4].mxu0  ;;  %v632_v47 = vshll.u32 %v604_v38, 16 }
 0x112   : > { %v645_v46 = vrot.slane %v643_v40, 7  ;;  %v650_v48 = vshrl.u32 %v607_v41, 16  ;;  %v510_v49 = vadd.f32 %v3064_v45, %v3482_v25  ;;  %v501_v50 = vpop.f32.mrb[5].mxu0  ;;  %v653_v53 = vshll.u32 %v607_v41, 16  ;;  %v3216_v45 = vld [vmem:[%s4763_s3 + $0x48] sm:$0xff]  }
 0x113   : > { %v631_v52 = vrot.slane %v629_v43, 7  ;;  %v636_v54 = vshrl.u32 %v605_v44, 16  ;;  %v502_v55 = vadd.f32 %v3482_v25, %v501_v50  ;;  %v3065_v56 = vpop.f32.mrb[6].mxu0  ;;  %v639_v1 = vshll.u32 %v605_v44, 16  ;;  %2928 = vmatprep.subr.bf16.mxu1 %v3216_v45  ;;  %v3222_v45 = vld [vmem:[%s4763_s3 + $0x60] sm:$0xff]  }
 0x114   : > { %v648_v57 = vor.u32 %v646_v42, %v645_v46  ;;  %v652_v58 = vrot.slane %v650_v48, 7  ;;  %v586_v60 = vmax.f32 %v510_v49, 0.0  ;;  %v513_v61 = vadd.f32 %v3065_v56, %v3482_v25  ;;  %v504_v62 = vpop.f32.mrb[7].mxu0  ;;  %v3217_v46 = vld [vmem:[%s4763_s3 + $0x8] sm:$0xff]  }
 0x115   : > { %v634_v63 = vor.u32 %v632_v47, %v631_v52  ;;  %v638_v0 = vrot.slane %v636_v54, 7  ;;  %v584_v2 = vmax.f32 %v502_v55, 0.0  ;;  %v505_v13 = vadd.f32 %v3482_v25, %v504_v62  ;;  %2929 = vmatpush3.bf16.msra.mxu1 %v3217_v46 }
 0x116   : > { %v825_v3 = vsel %vm3490_vm4, 0, %v648_v57  ;;  %v655_v4 = vor.u32 %v653_v53, %v652_v58  ;;  %v610_v5 = vpack.c.bf16 %v586_v60, %v586_v60  ;;  %v587_v9 = vmax.f32 %v513_v61, 0.0  ;;  %v3218_v60 = vld [vmem:[%s4763_s3 + $0x50] sm:$0xff]  }
 0x117   : > { %v641_v6 = vor.u32 %v639_v1, %v638_v0  ;;  %v608_v7 = vpack.c.bf16 %v584_v2, %v584_v2  ;;  %v3506_v8 = vsel %vm3497_vm5, %v825_v3, 0  ;;  %v823_v12 = vsel %vm3490_vm4, 0, %v634_v63  ;;  %v3219_v1 = vld [vmem:[%s4763_s3 + $0x10] sm:$0xff]   ;;  %2930 = vmatprep.subr.bf16.mxu1 %v3218_v60 }
 0x118   : > { %v671_v10 = vshrl.u32 %v610_v5, 16  ;;  %v674_v11 = vshll.u32 %v610_v5, 16  ;;  %1167 = vrot.lane.b32.xlu0 %v3506_v8, %s3324_s22  ;;  %1285 = vrot.lane.b32.xlu1 %v3506_v8, %s3322_s20  ;;  %v826_v18 = vsel %vm3490_vm4, 0, %v655_v4  ;;  %v1097_v22 = vrot.slane %v3506_v8, 1 }
 0x119   : > { %v824_v14 = vsel %vm3490_vm4, 0, %v641_v6  ;;  %v657_v15 = vshrl.u32 %v608_v7, 16  ;;  %v660_v16 = vshll.u32 %v608_v7, 16  ;;  %v3068_v17 = vpop.f32.mrb[8].mxu0  ;;  %v3528_v28 = vsel %vm3497_vm5, %v823_v12, 0  ;;  %2931 = vmatpush3.bf16.msra.mxu1 %v3219_v1  ;;  %v3224_v1 = vld [vmem:[%s4763_s3 + $0x68] sm:$0xff]  }
 0x11a   : > { %v3521_v19 = vsel %vm3497_vm5, %v824_v14, 0  ;;  %v673_v20 = vrot.slane %v671_v10, 7  ;;  %v3524_v26 = vpop.f32.mrb[9].mxu0  ;;  %v611_v30 = vpack.c.bf16 %v587_v9, %v587_v9  ;;  %v585_v35 = vmax.f32 %v505_v13, 0.0 }
 0x11b   : > { %v659_v27 = vrot.slane %v657_v15, 7  ;;  %v3531_v29 = vrot.slane %v3521_v19, 1  ;;  %v3069_v31 = vpop.f32.mrb[10].mxu0  ;;  %v3545_v41 = vsel %vm3497_vm5, %v826_v18, 0  ;;  %v1095_v56 = vrot.slane %v3528_v28, 1 }
 0x11c   : > { %v676_v34 = vor.u32 %v674_v11, %v673_v20  ;;  %1122 = vrot.lane.b32.xlu1 %v1097_v22, %s3322_s20  ;;  %1163 = vrot.lane.b32.xlu0 %v3528_v28, %s3324_s22  ;;  %v520_v36 = vpop.f32.mrb[11].mxu0  ;;  %v678_v39 = vshrl.u32 %v611_v30, 16  ;;  %v681_v40 = vshll.u32 %v611_v30, 16  ;;  %v609_v42 = vpack.c.bf16 %v585_v35, %v585_v35  ;;  %v3220_v20 = vld [vmem:[%s4763_s3 + $0x58] sm:$0xff]  }
 0x11d   : > { %v662_v37 = vor.u32 %v660_v16, %v659_v27  ;;  %v2748_v38 = vcombine.low %v3531_v29, %v1097_v22  ;;  %v3569_v53 = vrot.slane %v3545_v41, 1  ;;  %v526_v4 = vadd.f32 %v3068_v17, %v3482_v25  ;;  %2932 = vmatprep.subr.bf16.mxu1 %v3220_v20 }
 0x11e   : > { %v680_v44 = vrot.slane %v678_v39, 7  ;;  %v829_v47 = vsel %vm3490_vm4, 0, %v676_v34  ;;  %v664_v49 = vshrl.u32 %v609_v42, 16  ;;  %v667_v50 = vshll.u32 %v609_v42, 16 }
 0x11f   : > { %v827_v43 = vsel %vm3490_vm4, 0, %v662_v37  ;;  %3086 = vmatprep.mubr.msk.bf16.mxu0 %vm1371_vm6, %v2748_v38  ;;  %v3579_v61 = vsel %vm3497_vm5, %v829_v47, 0  ;;  %v898_v6 = vshll.u32 %v3506_v8, 16  ;;  %v529_v9 = vadd.f32 %v3069_v31, %v3482_v25 }
 0x120   : > { %v3560_v48 = vsel %vm3497_vm5, %v827_v43, 0  ;;  %1169 = vrot.lane.b32.xlu1 %v3545_v41, %s3324_s22  ;;  %1239 = vrot.lane.b32.xlu0 %v1097_v22, %s3323_s21  ;;  %v683_v54 = vor.u32 %v681_v40, %v680_v44  ;;  %v666_v57 = vrot.slane %v664_v49, 7  ;;  %4798 = vst [vmem:[#allocation6_spill] sm:$0xff] %v3579_v61  ;;  %v3607_v11 = vrot.slane %v3579_v61, 1  ;;  %v3221_v22 = vld [vmem:[%s4763_s3 + $0x18] sm:$0xff]  }
 0x121   : > { %v3566_v52 = vrot.slane %v3560_v48, 1  ;;  %v3571_v55 = vpop.f32.mrb[12].mxu0  ;;  %v590_v12 = vmax.f32 %v526_v4, 0.0  ;;  %v521_v13 = vadd.f32 %v3482_v25, %v520_v36  ;;  %v591_v17 = vmax.f32 %v529_v9, 0.0  ;;  %2933 = vmatpush3.bf16.msra.mxu1 %v3221_v22 }
 0x122   : > { %v533_v58 = vpop.f32.mrb[13].mxu0  ;;  %v830_v63 = vsel %vm3490_vm4, 0, %v683_v54  ;;  %v669_v3 = vor.u32 %v667_v50, %v666_v57  ;;  %v900_v27 = vrot.slane %v898_v6, 1  ;;  %v896_v37 = vshrl.u32 %v3506_v8, 16  ;;  %v3223_v54 = vld [vmem:[%s4763_s3 + $0x20] sm:$0xff]   ;;  %2934 = vmatprep.subr.bf16.mxu1 %v3222_v45 }
 0x123   : > { %v2751_v62 = vcombine.low %v3569_v53, %v3566_v52  ;;  %v3585_v0 = vpop.f32.mrb[14].mxu0  ;;  %v3595_v2 = vsel %vm3497_vm5, %v830_v63, 0  ;;  %v614_v16 = vpack.c.bf16 %v590_v12, %v590_v12  ;;  %v589_v18 = vmax.f32 %v521_v13, 0.0 }
 0x124   : > { %1287 = vrot.lane.b32.xlu0 %v3545_v41, %s3322_s20  ;;  %1118 = vrot.lane.b32.xlu1 %v1095_v56, %s3322_s20  ;;  %v3598_v5 = vpop.f32.mrb[15].mxu0  ;;  %v1232_v7 = vrot.slane %v3595_v2, 1  ;;  %v828_v10 = vsel %vm3490_vm4, 0, %v669_v3  ;;  %v534_v31 = vadd.f32 %v3482_v25, %v533_v58  ;;  %v615_v36 = vpack.c.bf16 %v591_v17, %v591_v17  ;;  %v3225_v3 = vld [vmem:[%s4763_s3 + $0x28] sm:$0xff]  }
 0x125   : > { %3087 = vmatmul.mubr.msk.bf16.vlgmr.msra.gmra.mrb[24].mxu0 %vm1371_vm6, %v2751_v62  ;;  %v3612_v14 = vsel %vm3497_vm5, %v828_v10, 0  ;;  %v699_v34 = vshrl.u32 %v614_v16, 16  ;;  %v702_v35 = vshll.u32 %v614_v16, 16  ;;  %v613_v38 = vpack.c.bf16 %v589_v18, %v589_v18  ;;  %2935 = vmatpush3.bf16.msra.mxu1 %v3223_v54 }
 0x126   : > { %4799 = vst [vmem:[#allocation7_spill] sm:$0xff] %v3612_v14  ;;  %v3618_v15 = vrot.slane %v3612_v14, 1  ;;  %v2757_v30 = vcombine.low %v1232_v7, %v3457_v21  ;;  %v706_v40 = vshrl.u32 %v615_v36, 16  ;;  %v709_v42 = vshll.u32 %v615_v36, 16  ;;  %2936 = vmatprep.subr.bf16.mxu1 %v3224_v1 }
 0x127   : > { %v701_v39 = vrot.slane %v699_v34, 7  ;;  %v592_v43 = vmax.f32 %v534_v31, 0.0  ;;  %v884_v46 = vshll.u32 %v3528_v28, 16  ;;  %v692_v47 = vshrl.u32 %v613_v38, 16  ;;  %v3227_v31 = vld [vmem:[%s4763_s3 + $0x30] sm:$0xff]  }
 0x128   : > { %1165 = vrot.lane.b32.xlu1 %v3521_v19, %s3324_s22  ;;  %1235 = vrot.lane.b32.xlu0 %v1095_v56, %s3323_s21  ;;  %v2754_v33 = vcombine.low %v3618_v15, %v3607_v11  ;;  %v695_v49 = vshll.u32 %v613_v38, 16  ;;  %v3651_v56 = vor.u32 %v900_v27, %v896_v37  ;;  %v708_v58 = vrot.slane %v706_v40, 7 }
 0x129   : > { %v3630_v32 = vpop.f32.mrb[16].mxu0  ;;  %v704_v57 = vor.u32 %v702_v35, %v701_v39  ;;  %v616_v60 = vpack.c.bf16 %v592_v43, %v592_v43  ;;  %v694_v63 = vrot.slane %v692_v47, 7  ;;  %v886_v12 = vrot.slane %v884_v46, 1  ;;  %2937 = vmatpush3.bf16.msra.mxu1 %v3225_v3  ;;  %v3228_v47 = vld [vmem:[%s4763_s3 + $0x78] sm:$0xff]  }
 0x12a   : > { %v3639_v44 = vpop.f32.mrb[17].mxu0  ;;  %3090 = vmatprep.mubr.msk.bf16.mxu0 %vm1371_vm6, %v2754_v33  ;;  %v711_v6 = vor.u32 %v709_v42, %v708_v58  ;;  %v905_v17 = vshll.u32 %v3545_v41, 16  ;;  %v882_v33 = vshrl.u32 %v3528_v28, 16  ;;  %v903_v54 = vshrl.u32 %v3545_v41, 16 }
 0x12b   : > { %v3646_v50 = vpop.f32.mrb[18].mxu0  ;;  %v833_v4 = vsel %vm3490_vm4, 0, %v704_v57  ;;  %v713_v9 = vshrl.u32 %v616_v60, 16  ;;  %v716_v10 = vshll.u32 %v616_v60, 16  ;;  %v697_v13 = vor.u32 %v695_v49, %v694_v63  ;;  %v3229_v49 = vld [vmem:[%s4763_s3 + $0x38] sm:$0xff]  }
 0x12c   : > { %1241 = vrot.lane.b32.xlu1 %v3569_v53, %s3323_s21  ;;  %1283 = vrot.lane.b32.xlu0 %v3521_v19, %s3322_s20  ;;  %v3654_v62 = vpop.f32.mrb[19].mxu0  ;;  %v3673_v18 = vsel %vm3497_vm5, %v833_v4, 0  ;;  %v3706_v39 = vor.u32 %v886_v12, %v882_v33  ;;  %v907_v40 = vrot.slane %v905_v17, 1  ;;  %v891_v60 = vshll.u32 %v3521_v19, 16 }
 0x12d   : > { %3091 = vmatmul.mubr.msk.bf16.gmra.mrb[28].mxu0 %vm1371_vm6, %v2757_v30  ;;  %4800 = vst [vmem:[#allocation8_spill] sm:$0xff] %v3673_v18  ;;  %v715_v20 = vrot.slane %v713_v9, 7  ;;  %v832_v27 = vsel %vm3490_vm4, 0, %v697_v13  ;;  %v3226_v30 = vld [vmem:[%s4763_s3 + $0x70] sm:$0xff]   ;;  %v3704_v38 = vrot.slane %v3673_v18, 1  ;;  %v889_v1 = vshrl.u32 %v3521_v19, 16 }
 0x12e   : > { %v3698_v35 = vsel %vm3497_vm5, %v832_v27, 0  ;;  %2938 = vmatprep.subr.bf16.mxu1 %v3226_v30  ;;  %v3734_v58 = vor.u32 %v907_v40, %v903_v54  ;;  %v926_v4 = vshll.u32 %v3579_v61, 16  ;;  %v912_v13 = vshll.u32 %v3560_v48, 16 }
 0x12f   : > { %4802 = vst [vmem:[#allocation10_spill] sm:$0xff] %v3698_v35  ;;  %v718_v36 = vor.u32 %v716_v10, %v715_v20  ;;  %v3701_v37 = vrot.slane %v3698_v35, 1  ;;  %2939 = vmatpush3.bf16.msra.mxu1 %v3227_v31  ;;  %v518_v17 = vadd.f32 %v3482_v25, %v3524_v26  ;;  %v917_v26 = vshrl.u32 %v3612_v14, 16 }
 0x130   : > { %1329 = vrot.lane.b32.xlu1 %v3651_v56, %s3324_s22  ;;  %1124 = vrot.lane.b32.xlu0 %v3569_v53, %s3322_s20  ;;  %v834_v53 = vsel %vm3490_vm4, 0, %v711_v6  ;;  %v924_v6 = vshrl.u32 %v3579_v61, 16  ;;  %v928_v9 = vrot.slane %v926_v4, 1  ;;  %v1214_v31 = vshll.u32 %v3595_v2, 16  ;;  %v3843_v4 = vpop.permute.xlu0 %3188 }
 0x131   : > { %v3668_v16 = vpop.f32.mrb[20].mxu0  ;;  %v3694_v34 = vsel %vm3497_vm5, %v834_v53, 0  ;;  %v835_v42 = vsel %vm3490_vm4, 0, %v718_v36  ;;  %v2760_v45 = vcombine.low %v3701_v37, %v3704_v38  ;;  %2940 = vmatprep.subr.bf16.mxu1 %v3228_v47  ;;  %v919_v53 = vshll.u32 %v3612_v14, 16 }
 0x132   : > { %v3677_v22 = vpop.f32.mrb[21].mxu0  ;;  %4801 = vst [vmem:[#allocation9_spill] sm:$0xff] %v3694_v34  ;;  %v3712_v43 = vsel %vm3497_vm5, %v835_v42, 0  ;;  %v3717_v46 = vrot.slane %v3694_v34, 1  ;;  %v3783_v12 = vor.u32 %v928_v9, %v924_v6  ;;  %v588_v20 = vmax.f32 %v518_v17, 0.0 }
 0x133   : > { %v3731_v57 = vrot.slane %v3712_v43, 1  ;;  %3094 = vmatprep.mubr.msk.bf16.mxu0 %vm1371_vm6, %v2760_v45  ;;  %2941 = vmatpush3.bf16.msra.mxu1 %v3229_v49  ;;  %v3779_v10 = vpop.f32.mrb[22].mxu0  ;;  %v921_v30 = vrot.slane %v919_v53, 1  ;;  %v1216_v40 = vrot.slane %v1214_v31, 1  ;;  %v947_v9 = vshll.u32 %v3673_v18, 16 }
 0x134   : > { %1034 = vrot.lane.b32.xlu1 %v3651_v56, %s3323_s21  ;;  %1237 = vrot.lane.b32.xlu0 %v3531_v29, %s3323_s21  ;;  %4803 = vst [vmem:[#allocation11_spill] sm:$0xff] %v3779_v10  ;;  %v612_v33 = vpack.c.bf16 %v588_v20, %v588_v20  ;;  %v537_v31 = vadd.f32 %v3482_v25, %v3598_v5 }
 0x135   : > { %v2763_v63 = vcombine.low %v3717_v46, %v3731_v57  ;;  %3138 = vmatprep.subr.bf16.mxu1 %v3468_v23  ;;  %v3806_v36 = vor.u32 %v921_v30, %v917_v26 }
 0x136   : > { %v685_v42 = vshrl.u32 %v612_v33, 16  ;;  %v688_v49 = vshll.u32 %v612_v33, 16  ;;  %v593_v5 = vmax.f32 %v537_v31, 0.0 }
 0x137   : > { %3095 = vmatmul.mubr.msk.bf16.gmra.mrb[32].mxu0 %vm1371_vm6, %v2763_v63  ;;  %v542_v63 = vadd.f32 %v3571_v55, %v3482_v25  ;;  %v545_v55 = vadd.f32 %v3585_v0, %v3482_v25  ;;  %v945_v0 = vshrl.u32 %v3673_v18, 16 }
 0x138   : > { %1120 = vrot.lane.b32.xlu0 %v3531_v29, %s3322_s20  ;;  %1030 = vrot.lane.b32.xlu1 %v3706_v39, %s3323_s21  ;;  %v893_v29 = vrot.slane %v891_v60, 1  ;;  %v687_v47 = vrot.slane %v685_v42, 7 }
 0x139   : > { %v595_v17 = vmax.f32 %v545_v55, 0.0 }
 0x13a   : > { %v3750_v3 = vor.u32 %v893_v29, %v889_v1  ;;  %v690_v54 = vor.u32 %v688_v49, %v687_v47  ;;  %v594_v1 = vmax.f32 %v542_v63, 0.0  ;;  %v954_v49 = vshll.u32 %v3694_v34, 16 }
 0x13b   : > { %v619_v30 = vpack.c.bf16 %v595_v17, %v595_v17  ;;  %v617_v17 = vpack.c.bf16 %v593_v5, %v593_v5 }
 0x13c   : > { %1331 = vrot.lane.b32.xlu0 %v3734_v58, %s3324_s22  ;;  %1293 = vrot.lane.b32.xlu1 %v3579_v61, %s3322_s20  ;;  %v618_v6 = vpack.c.bf16 %v594_v1, %v594_v1  ;;  %v952_v1 = vshrl.u32 %v3694_v34, 16 }
 0x13e   : > { %v730_v26 = vshll.u32 %v618_v6, 16 }
 0x140   : > { %1036 = vrot.lane.b32.xlu0 %v3734_v58, %s3323_s21  ;;  %1175 = vrot.lane.b32.xlu1 %v3579_v61, %s3324_s22 }
 0x144   : > { %1327 = vrot.lane.b32.xlu0 %v3750_v3, %s3324_s22  ;;  %1289 = vrot.lane.b32.xlu1 %v3560_v48, %s3322_s20 }
 0x148   : > { %1032 = vrot.lane.b32.xlu0 %v3750_v3, %s3323_s21  ;;  %1126 = vrot.lane.b32.xlu1 %v3566_v52, %s3322_s20 }
 0x14c   : > { %1171 = vrot.lane.b32.xlu0 %v3560_v48, %s3324_s22  ;;  %1173 = vrot.lane.b32.xlu1 %v3612_v14, %s3324_s22 }
 0x150   : > { %1247 = vrot.lane.b32.xlu0 %v3607_v11, %s3323_s21  ;;  %1249 = vrot.lane.b32.xlu1 %v1232_v7, %s3323_s21  ;;  %v3781_v7 = vpop.f32.mrb[23].mxu0 }
 0x154   : > { %1295 = vrot.lane.b32.xlu0 %v3595_v2, %s3322_s20  ;;  %1245 = vrot.lane.b32.xlu1 %v3618_v15, %s3323_s21 }
 0x158   : > { %1130 = vrot.lane.b32.xlu0 %v3607_v11, %s3322_s20  ;;  %1128 = vrot.lane.b32.xlu1 %v3618_v15, %s3322_s20  ;;  %v910_v11 = vshrl.u32 %v3560_v48, 16  ;;  %v914_v15 = vrot.slane %v912_v13, 1  ;;  %v727_v13 = vshrl.u32 %v618_v6, 16  ;;  %v956_v6 = vrot.slane %v954_v49, 1 }
 0x159   : > { %v723_v49 = vshll.u32 %v617_v17, 16 }
 0x15a   : > { %v3798_v27 = vor.u32 %v914_v15, %v910_v11  ;;  %v3857_v11 = vpop.permute.xlu1 %1028  ;;  %v949_v15 = vrot.slane %v947_v9, 1  ;;  %v729_v20 = vrot.slane %v727_v13, 7  ;;  %v737_v13 = vshll.u32 %v619_v30, 16 }
 0x15c   : > { %1177 = vrot.lane.b32.xlu0 %v3595_v2, %s3324_s22  ;;  %1337 = vrot.lane.b32.xlu1 %v3783_v12, %s3324_s22 }
 0x160   : > { %1243 = vrot.lane.b32.xlu0 %v3566_v52, %s3323_s21  ;;  %1042 = vrot.lane.b32.xlu1 %v3783_v12, %s3323_s21  ;;  %v1212_v52 = vshrl.u32 %v3595_v2, 16  ;;  %v831_v2 = vsel %vm3490_vm4, 0, %v690_v54  ;;  %v732_v54 = vor.u32 %v730_v26, %v729_v20  ;;  %v720_v26 = vshrl.u32 %v617_v17, 16 }
 0x161   : > { %v3831_v60 = vsel %vm3497_vm5, %v831_v2, 0  ;;  %v734_v2 = vshrl.u32 %v619_v30, 16 }
 0x162   : > { %v3813_v45 = vor.u32 %v1216_v40, %v1212_v52  ;;  %4804 = vst [vmem:[#allocation12_spill] sm:$0xff] %v3831_v60  ;;  %v1102_v29 = vrot.slane %v3831_v60, 1  ;;  %v933_v53 = vshll.u32 %v3831_v60, 16  ;;  %v3871_v40 = vor.u32 %v949_v15, %v945_v0 }
 0x163   : > { %v931_v42 = vshrl.u32 %v3831_v60, 16  ;;  %v837_v55 = vsel %vm3490_vm4, 0, %v732_v54  ;;  %v736_v9 = vrot.slane %v734_v2, 7  ;;  %v3896_v15 = vor.u32 %v956_v6, %v952_v1 }
 0x164   : > { %1291 = vrot.lane.b32.xlu0 %v3612_v14, %s3322_s20  ;;  %1333 = vrot.lane.b32.xlu1 %v3798_v27, %s3324_s22  ;;  %4806 = vst [vmem:[#allocation14_spill] sm:$0xff] %v3871_v40  ;;  %v935_v47 = vrot.slane %v933_v53, 1  ;;  %v3900_v53 = vsel %vm3497_vm5, %v837_v55, 0  ;;  %v938_v1 = vshrl.u32 %v3698_v35, 16  ;;  %v550_v14 = vadd.f32 %v3482_v25, %v3639_v44 }
 0x165   : > { %4808 = vst [vmem:[#allocation16_spill] sm:$0xff] %v3896_v15  ;;  %4809 = vst [vmem:[#allocation17_spill] sm:$0xff] %v3900_v53  ;;  %v739_v20 = vor.u32 %v737_v13, %v736_v9 }
 0x167   : > { %v838_v54 = vsel %vm3490_vm4, 0, %v739_v20 }
 0x168   : > { %1335 = vrot.lane.b32.xlu0 %v3806_v36, %s3324_s22  ;;  %1038 = vrot.lane.b32.xlu1 %v3798_v27, %s3323_s21  ;;  %v3920_v55 = vsel %vm3497_vm5, %v838_v54, 0  ;;  %v558_v54 = vadd.f32 %v3630_v32, %v3482_v25  ;;  %v3962_v32 = vrot.slane %v3900_v53, 1 }
 0x16c   : > { %1040 = vrot.lane.b32.xlu0 %v3806_v36, %s3323_s21  ;;  %1339 = vrot.lane.b32.xlu1 %v3813_v45, %s3324_s22 }
 0x170   : > { %1136 = vrot.lane.b32.xlu0 %v3704_v38, %s3322_s20  ;;  %1301 = vrot.lane.b32.xlu1 %v3673_v18, %s3322_s20 }
 0x174   : > { %1185 = vrot.lane.b32.xlu0 %v3694_v34, %s3324_s22  ;;  %1183 = vrot.lane.b32.xlu1 %v3673_v18, %s3324_s22 }
 0x178   : > { %1299 = vrot.lane.b32.xlu0 %v3698_v35, %s3322_s20  ;;  %1179 = vrot.lane.b32.xlu1 %v3831_v60, %s3324_s22  ;;  %v561_v60 = vadd.f32 %v3646_v50, %v3482_v25 }
 0x17c   : > { %1132 = vrot.lane.b32.xlu0 %v1102_v29, %s3322_s20  ;;  %1255 = vrot.lane.b32.xlu1 %v3704_v38, %s3323_s21  ;;  %v3855_v38 = vpop.permute.xlu0 %1341 }
 0x17d   : > { %4805 = vst [vmem:[#allocation13_spill] sm:$0xff] %v3855_v38  ;;  %v3190_v38 = vunpack.i.l.bf16 %v3843_v4 }
 0x180   : > { %1181 = vrot.lane.b32.xlu0 %v3698_v35, %s3324_s22  ;;  %1303 = vrot.lane.b32.xlu1 %v3694_v34, %s3322_s20 }
 0x184   : > { %1257 = vrot.lane.b32.xlu0 %v3717_v46, %s3323_s21  ;;  %1251 = vrot.lane.b32.xlu1 %v1102_v29, %s3323_s21  ;;  %v3883_v29 = vor.u32 %v935_v47, %v931_v42  ;;  %v940_v42 = vshll.u32 %v3698_v35, 16  ;;  %v722_v47 = vrot.slane %v720_v26, 7 }
 0x186   : > { %4807 = vst [vmem:[#allocation15_spill] sm:$0xff] %v3883_v29  ;;  %v942_v6 = vrot.slane %v940_v42, 1  ;;  %v725_v9 = vor.u32 %v723_v49, %v722_v47 }
 0x188   : > { %1253 = vrot.lane.b32.xlu0 %v3701_v37, %s3323_s21  ;;  %1138 = vrot.lane.b32.xlu1 %v3717_v46, %s3322_s20  ;;  %v3928_v20 = vor.u32 %v942_v6, %v938_v1  ;;  %v836_v26 = vsel %vm3490_vm4, 0, %v725_v9  ;;  %v4774_v9 = vrot.slane %v3920_v55, 1 }
 0x189   : > { %v3940_v49 = vsel %vm3497_vm5, %v836_v26, 0  ;;  %v598_v26 = vmax.f32 %v558_v54, 0.0 }
 0x18a   : > { %v3867_v33 = vpop.permute.xlu0 %1167  ;;  %v3869_v52 = vpop.permute.xlu1 %1285  ;;  %4810 = vst [vmem:[#allocation18_spill] sm:$0xff] %v3928_v20 }
 0x18b   : > { %v622_v35 = vpack.c.bf16 %v598_v26, %v598_v26 }
 0x18c   : > { %1345 = vrot.lane.b32.xlu0 %v3871_v40, %s3324_s22  ;;  %1134 = vrot.lane.b32.xlu1 %v3701_v37, %s3322_s20 }
 0x18d   : > { %v755_v18 = vshrl.u32 %v622_v35, 16 }
 0x18e   : > { %v3879_v46 = vpop.permute.xlu1 %1122  ;;  %v3881_v63 = vpop.permute.xlu0 %1163 }
 0x18f   : > { %v757_v10 = vrot.slane %v755_v18, 7 }
 0x190   : > { %1048 = vrot.lane.b32.xlu0 %v3871_v40, %s3323_s21  ;;  %1044 = vrot.lane.b32.xlu1 %v3883_v29, %s3323_s21  ;;  %v975_v40 = vshll.u32 %v3900_v53, 16 }
 0x192   : > { %v3892_v37 = vpop.permute.xlu1 %1169  ;;  %v3894_v0 = vpop.permute.xlu0 %1239  ;;  %v977_v29 = vrot.slane %v975_v40, 1  ;;  %v1373_v40 = vsel %vm1371_vm6, 0, %v3857_v11  ;;  %v553_v11 = vadd.f32 %v3482_v25, %v3654_v62 }
 0x194   : > { %1309 = vrot.lane.b32.xlu0 %v3900_v53, %s3322_s20  ;;  %1347 = vrot.lane.b32.xlu1 %v3896_v15, %s3324_s22 }
 0x196   : > { %v3906_v30 = vpop.permute.xlu0 %1287  ;;  %v1119_v31 = vpop.permute.xlu1 %1118 }
 0x198   : > { %1305 = vrot.lane.b32.xlu0 %v3712_v43, %s3322_s20  ;;  %1050 = vrot.lane.b32.xlu1 %v3896_v15, %s3323_s21  ;;  %v3959_v15 = vrot.slane %v3940_v49, 1 }
 0x19a   : > { %v3915_v2 = vpop.permute.xlu1 %1165  ;;  %v1236_v5 = vpop.permute.xlu0 %1235  ;;  %4812 = vst [vmem:[#allocation20_spill] sm:$0xff] %v3959_v15 }
 0x19b   : > { %v1512_v44 = vsel %vm1371_vm6, %v3706_v39, %v1236_v5 }
 0x19c   : > { %1193 = vrot.lane.b32.xlu0 %v3920_v55, %s3324_s22  ;;  %1191 = vrot.lane.b32.xlu1 %v3900_v53, %s3324_s22 }
 0x19e   : > { %v3926_v13 = vpop.permute.xlu1 %1241  ;;  %v1284_v17 = vpop.permute.xlu0 %1283 }
 0x19f   : > { %v1583_v18 = vsel %vm1416_vm7, %v1512_v44, %v1284_v17  ;;  %v597_v17 = vmax.f32 %v553_v11, 0.0 }
 0x1a0   : > { %1140 = vrot.lane.b32.xlu0 %v3731_v57, %s3322_s20  ;;  %1343 = vrot.lane.b32.xlu1 %v3928_v20, %s3324_s22 }
 0x1a2   : > { %v1330_v42 = vpop.permute.xlu1 %1329  ;;  %v3936_v47 = vpop.permute.xlu0 %1124 }
 0x1a3   : > { %4811 = vst [vmem:[#allocation19_spill] sm:$0xff] %v3936_v47  ;;  %v599_v47 = vmax.f32 %v561_v60, 0.0 }
 0x1a4   : > { %1189 = vrot.lane.b32.xlu0 %v3940_v49, %s3324_s22  ;;  %1046 = vrot.lane.b32.xlu1 %v3928_v20, %s3323_s21  ;;  %v973_v20 = vshrl.u32 %v3900_v53, 16 }
 0x1a6   : > { %v3948_v1 = vpop.permute.xlu1 %1034  ;;  %v1238_v6 = vpop.permute.xlu0 %1237 }
 0x1a7   : > { %v1515_v61 = vsel %vm1371_vm6, %v3750_v3, %v1238_v6  ;;  %v758_v3 = vshll.u32 %v622_v35, 16 }
 0x1a8   : > { %1265 = vrot.lane.b32.xlu0 %v4774_v9, %s3323_s21  ;;  %1187 = vrot.lane.b32.xlu1 %v3712_v43, %s3324_s22 }
 0x1a9   : > { %v760_v5 = vor.u32 %v758_v3, %v757_v10  ;;  %v621_v3 = vpack.c.bf16 %v597_v17, %v597_v17 }
 0x1aa   : > { %v3956_v21 = vpop.permute.xlu0 %1120  ;;  %v1031_v34 = vpop.permute.xlu1 %1030 }
 0x1ab   : > { %v1375_v26 = vsel %vm1371_vm6, %v3528_v28, %v1031_v34  ;;  %v3991_v28 = vor.u32 %v977_v29, %v973_v20  ;;  %v961_v34 = vshll.u32 %v3712_v43, 16  ;;  %v1585_v29 = vsel %vm1416_vm7, %v1515_v61, %v3869_v52 }
 0x1ac   : > { %1261 = vrot.lane.b32.xlu0 %v3959_v15, %s3323_s21  ;;  %1263 = vrot.lane.b32.xlu1 %v3962_v32, %s3323_s21  ;;  %v959_v20 = vshrl.u32 %v3712_v43, 16  ;;  %v623_v61 = vpack.c.bf16 %v599_v47, %v599_v47  ;;  %v1631_v52 = vsel %vm1461_vm8, %v1585_v29, %v1330_v42  ;;  %v1221_v42 = vshll.u32 %v3920_v55, 16 }
 0x1ad   : > { %v963_v6 = vrot.slane %v961_v34, 1  ;;  %v841_v10 = vsel %vm3490_vm4, 0, %v760_v5  ;;  %v1219_v29 = vshrl.u32 %v3920_v55, 16 }
 0x1ae   : > { %v3969_v9 = vpop.permute.xlu0 %1331  ;;  %v3971_v54 = vpop.permute.xlu1 %1293  ;;  %v762_v34 = vshrl.u32 %v623_v61, 16  ;;  %v1223_v44 = vrot.slane %v1221_v42, 1  ;;  %v751_v42 = vshll.u32 %v621_v3, 16 }
 0x1b0   : > { %1142 = vrot.lane.b32.xlu0 %v3959_v15, %s3322_s20  ;;  %1311 = vrot.lane.b32.xlu1 %v3920_v55, %s3322_s20  ;;  %v1420_v15 = vsel %vm1416_vm7, %v1375_v26, %v1119_v31  ;;  %v4006_v31 = vsel %vm1416_vm7, %v1373_v40, %v3190_v38  ;;  %v596_v26 = vmax.f32 %v550_v14, 0.0  ;;  %v4027_v40 = vor.u32 %v963_v6, %v959_v20 }
 0x1b1   : > { %v1465_v60 = vsel %vm1461_vm8, %v1420_v15, %v3915_v2  ;;  %v1463_v39 = vsel %vm1461_vm8, %v4006_v31, %v3881_v63  ;;  %v764_v20 = vrot.slane %v762_v34, 7  ;;  %v765_v6 = vshll.u32 %v623_v61, 16 }
 0x1b2   : > { %v3987_v50 = vpop.permute.xlu0 %1036  ;;  %v3989_v53 = vpop.permute.xlu1 %1175  ;;  %v2746_v2 = vcombine.low %v1463_v39, %v1465_v60  ;;  %v620_v63 = vpack.c.bf16 %v596_v26, %v596_v26  ;;  %v748_v26 = vshrl.u32 %v621_v3, 16  ;;  %v966_v39 = vshrl.u32 %v3940_v49, 16 }
 0x1b4   : > { %1353 = vrot.lane.b32.xlu0 %v3991_v28, %s3324_s22  ;;  %1144 = vrot.lane.b32.xlu1 %v3962_v32, %s3322_s20  ;;  %v741_v60 = vshrl.u32 %v620_v63, 16  ;;  %v744_v17 = vshll.u32 %v620_v63, 16 }
 0x1b6   : > { %v1328_v35 = vpop.permute.xlu0 %1327  ;;  %v4011_v62 = vpop.permute.xlu1 %1289  ;;  %v743_v61 = vrot.slane %v741_v60, 7 }
 0x1b7   : > { %v1629_v38 = vsel %vm1461_vm8, %v1583_v18, %v1328_v35  ;;  %v968_v18 = vshll.u32 %v3940_v49, 16  ;;  %v4046_v35 = vsel %vm3497_vm5, %v841_v10, 0 }
 0x1b8   : > { %1056 = vrot.lane.b32.xlu0 %v3991_v28, %s3323_s21  ;;  %1259 = vrot.lane.b32.xlu1 %v3731_v57, %s3323_s21  ;;  %v2747_v15 = vcombine.low %v1629_v38, %v1631_v52  ;;  %v4057_v52 = vor.u32 %v1223_v44, %v1219_v29  ;;  %v4067_v34 = vrot.slane %v4046_v35, 1  ;;  %v746_v44 = vor.u32 %v744_v17, %v743_v61 }
 0x1b9   : > { %v970_v5 = vrot.slane %v968_v18, 1 }
 0x1ba   : > { %v1033_v14 = vpop.permute.xlu0 %1032  ;;  %v4025_v47 = vpop.permute.xlu1 %1126  ;;  %2071 = vmatprep.mubr.bf16.mxu1 %v2747_v15  ;;  %v767_v15 = vor.u32 %v765_v6, %v764_v20 }
 0x1bb   : > { %2072 = vmatmul.mubr.bf16.vlgmr.msra.gmra.mrb[0].mxu1 %v2746_v2  ;;  %v750_v2 = vrot.slane %v748_v26, 7  ;;  %v4069_v29 = vor.u32 %v970_v5, %v966_v39  ;;  %v839_v26 = vsel %vm3490_vm4, 0, %v746_v44  ;;  %v574_v39 = vadd.f32 %v3668_v16, %v3482_v25 }
 0x1bc   : > { %1349 = vrot.lane.b32.xlu0 %v4027_v40, %s3324_s22  ;;  %1307 = vrot.lane.b32.xlu1 %v3940_v49, %s3322_s20  ;;  %v842_v63 = vsel %vm3490_vm4, 0, %v767_v15  ;;  %v4103_v15 = vsel %vm3497_vm5, %v839_v26, 0  ;;  %v1379_v44 = vsel %vm1371_vm6, %v3506_v8, %v3948_v1  ;;  %v1521_v8 = vsel %vm1371_vm6, %v3734_v58, %v3926_v13 }
 0x1bd   : > { %3140 = vmatpush3.bf16.msra.mxu1 %v3468_v23  ;;  %v753_v18 = vor.u32 %v751_v42, %v750_v2  ;;  %v4083_v20 = vsel %vm3497_vm5, %v842_v63, 0  ;;  %v566_v2 = vadd.f32 %v3482_v25, %v3677_v22  ;;  %v1377_v42 = vsel %vm1371_vm6, %v3521_v19, %v1033_v14 }
 0x1be   : > { %v4037_v57 = vpop.permute.xlu0 %1171  ;;  %v4039_v11 = vpop.permute.xlu1 %1173  ;;  %3139 = vmatprep.subr.bf16.mxu1 %v3475_v24  ;;  %v602_v16 = vmax.f32 %v574_v39, 0.0  ;;  %v1422_v25 = vsel %vm1416_vm7, %v1377_v42, %v3956_v21  ;;  %v1518_v22 = vsel %vm1371_vm6, %v3651_v56, %v3894_v0  ;;  %v1424_v1 = vsel %vm1416_vm7, %v1379_v44, %v3879_v46  ;;  %v3244_v44 = vld [vmem:[%s4762_s2] ss:$0 sm:$0xff] }
 0x1bf   : > { %v840_v6 = vsel %vm3490_vm4, 0, %v753_v18  ;;  %v600_v19 = vmax.f32 %v566_v2, 0.0  ;;  %v1587_v21 = vsel %vm1416_vm7, %v1518_v22, %v3906_v30  ;;  %v1589_v26 = vsel %vm1416_vm7, %v1521_v8, %v4011_v62 }
 0x1c0   : > { %1052 = vrot.lane.b32.xlu0 %v4027_v40, %s3323_s21  ;;  %1315 = vrot.lane.b32.xlu1 %v4046_v35, %s3322_s20  ;;  %v4099_v61 = vsel %vm3497_vm5, %v840_v6, 0  ;;  %v1109_v6 = vrot.slane %v4103_v15, 1  ;;  %v4132_v14 = vpack.c.bf16 %v602_v16, %v602_v16  ;;  %v1467_v56 = vsel %vm1461_vm8, %v1422_v25, %v3867_v33 }
 0x1c1   : > { %3141 = vmatpush3.bf16.msra.mxu1 %v3475_v24  ;;  %v1633_v0 = vsel %vm1461_vm8, %v1587_v21, %v3969_v9  ;;  %v4146_v13 = vunpack.i.h.bf16 %v3843_v4  ;;  %v4148_v30 = vpack.c.bf16 %v600_v19, %v600_v19  ;;  %v1469_v33 = vsel %vm1461_vm8, %v1424_v1, %v3892_v37 }
 0x1c2   : > { %v4053_v23 = vpop.permute.xlu0 %1247  ;;  %v4055_v38 = vpop.permute.xlu1 %1249  ;;  %v783_v9 = vshrl.u32 %v4132_v14, 16  ;;  %v2749_v62 = vcombine.low %v1467_v56, %v1469_v33  ;;  %v4160_v4 = vrot.slane %v4083_v20, 1  ;;  %v569_v37 = vadd.f32 %v3244_v44, %v3781_v7  ;;  %v4817_v33 = vld [vmem:[#allocation7_spill] sm:$0xff] }
 0x1c3   : > { %v786_v1 = vshll.u32 %v4132_v14, 16  ;;  %v1533_v7 = vsel %vm1371_vm6, %v3813_v45, %v4055_v38  ;;  %v1530_v45 = vsel %vm1371_vm6, %v3783_v12, %v4053_v23  ;;  %v4815_v38 = vld [vmem:[#allocation11_spill] sm:$0xff] }
 0x1c4   : > { %1355 = vrot.lane.b32.xlu0 %v4057_v52, %s3324_s22  ;;  %1199 = vrot.lane.b32.xlu1 %v4046_v35, %s3324_s22  ;;  %4813 = vst [vmem:[#allocation21_spill] sm:$0xff] %v4160_v4  ;;  %v785_v56 = vrot.slane %v783_v9, 7  ;;  %v601_v23 = vmax.f32 %v569_v37, 0.0  ;;  %v4819_v37 = vld [vmem:[#allocation13_spill] sm:$0xff] }
 0x1c6   : > { %v4064_v24 = vpop.permute.xlu0 %1295  ;;  %v1246_v10 = vpop.permute.xlu1 %1245 }
 0x1c7   : > { %v1527_v58 = vsel %vm1371_vm6, %v3806_v36, %v1246_v10 }
 0x1c8   : > { %1150 = vrot.lane.b32.xlu0 %v4067_v34, %s3322_s20  ;;  %1351 = vrot.lane.b32.xlu1 %v4069_v29, %s3324_s22  ;;  %v1593_v10 = vsel %vm1416_vm7, %v1527_v58, %v3971_v54 }
 0x1ca   : > { %v4077_v3 = vpop.permute.xlu0 %1130  ;;  %v4079_v60 = vpop.permute.xlu1 %1128 }
 0x1cc   : > { %1201 = vrot.lane.b32.xlu0 %v4083_v20, %s3324_s22  ;;  %1054 = vrot.lane.b32.xlu1 %v4069_v29, %s3323_s21 }
 0x1ce   : > { %v4095_v5 = vpop.permute.xlu0 %1177  ;;  %v1338_v17 = vpop.permute.xlu1 %1337 }
 0x1cf   : > { %v1639_v22 = vsel %vm1461_vm8, %v1593_v10, %v1338_v17  ;;  %v982_v17 = vshll.u32 %v4103_v15, 16 }
 0x1d0   : > { %1313 = vrot.lane.b32.xlu0 %v4099_v61, %s3322_s20  ;;  %1195 = vrot.lane.b32.xlu1 %v4103_v15, %s3324_s22 }
 0x1d1   : > { %v984_v10 = vrot.slane %v982_v17, 1 }
 0x1d2   : > { %v1244_v63 = vpop.permute.xlu0 %1243  ;;  %v4116_v18 = vpop.permute.xlu1 %1042 }
 0x1d3   : > { %v1524_v36 = vsel %vm1371_vm6, %v3798_v27, %v1244_v63  ;;  %v996_v27 = vshll.u32 %v4046_v35, 16  ;;  %v1381_v63 = vsel %vm1371_vm6, %v3545_v41, %v3987_v50  ;;  %v769_v41 = vshrl.u32 %v4148_v30, 16 }
 0x1d4   : > { %1146 = vrot.lane.b32.xlu0 %v1109_v6, %s3322_s20  ;;  %1271 = vrot.lane.b32.xlu1 %v4067_v34, %s3323_s21  ;;  %v994_v50 = vshrl.u32 %v4046_v35, 16 }
 0x1d6   : > { %v1292_v39 = vpop.permute.xlu0 %1291  ;;  %v1334_v2 = vpop.permute.xlu1 %1333 }
 0x1d7   : > { %v1635_v46 = vsel %vm1461_vm8, %v1589_v26, %v1334_v2  ;;  %v1591_v16 = vsel %vm1416_vm7, %v1524_v36, %v1292_v39  ;;  %v998_v2 = vrot.slane %v996_v27, 1 }
 0x1d8   : > { %v2750_v42 = vcombine.low %v1633_v0, %v1635_v46  ;;  %1197 = vrot.lane.b32.xlu0 %v4099_v61, %s3324_s22  ;;  %1317 = vrot.lane.b32.xlu1 %v4083_v20, %s3322_s20  ;;  %v4816_v0 = vld [vmem:[#allocation19_spill] sm:$0xff]  ;;  %v1597_v46 = vsel %vm1416_vm7, %v1533_v7, %v4146_v13  ;;  %v771_v7 = vrot.slane %v769_v41, 7 }
 0x1d9   : > { %v1426_v58 = vsel %vm1416_vm7, %v1381_v63, %v4816_v0  ;;  %v4224_v63 = vor.u32 %v998_v2, %v994_v50  ;;  %v1001_v50 = vshrl.u32 %v4083_v20, 16  ;;  %v989_v0 = vshll.u32 %v4099_v61, 16 }
 0x1da   : > { %v1336_v25 = vpop.permute.xlu0 %1335  ;;  %v1039_v19 = vpop.permute.xlu1 %1038  ;;  %2079 = vmatprep.mubr.bf16.mxu1 %v2750_v42  ;;  %v1595_v42 = vsel %vm1416_vm7, %v1530_v45, %v4064_v24  ;;  %v1471_v12 = vsel %vm1461_vm8, %v1426_v58, %v4037_v57  ;;  %v1003_v24 = vshll.u32 %v4083_v20, 16  ;;  %v4818_v57 = vld [vmem:[#allocation6_spill] sm:$0xff] }
 0x1db   : > { %v1637_v54 = vsel %vm1461_vm8, %v1591_v16, %v1336_v25  ;;  %v1383_v8 = vsel %vm1371_vm6, %v3560_v48, %v1039_v19  ;;  %2080 = vmatmul.mubr.bf16.gmra.mrb[4].mxu1 %v2749_v62  ;;  %v4188_v48 = vrot.slane %v4099_v61, 1  ;;  %v980_v62 = vshrl.u32 %v4103_v15, 16 }
 0x1dc   : > { %v2753_v21 = vcombine.low %v1637_v54, %v1639_v22  ;;  %v1428_v26 = vsel %vm1416_vm7, %v1383_v8, %v4025_v47  ;;  %1273 = vrot.lane.b32.xlu0 %v4160_v4, %s3323_s21  ;;  %1267 = vrot.lane.b32.xlu1 %v1109_v6, %s3323_s21  ;;  %v577_v47 = vadd.f32 %v3244_v44, %v4815_v38  ;;  %v1005_v45 = vrot.slane %v1003_v24, 1 }
 0x1dd   : > { %4814 = vst [vmem:[#allocation22_spill] sm:$0xff] %v4188_v48  ;;  %v1473_v6 = vsel %vm1461_vm8, %v1428_v26, %v4039_v11  ;;  %v1387_v16 = vsel %vm1371_vm6, %v4818_v57, %v4116_v18  ;;  %v1643_v25 = vsel %vm1461_vm8, %v1597_v46, %v4819_v37  ;;  %v788_v8 = vor.u32 %v786_v1, %v785_v56 }
 0x1de   : > { %v1041_v14 = vpop.permute.xlu0 %1040  ;;  %v1340_v39 = vpop.permute.xlu1 %1339  ;;  %2087 = vmatprep.mubr.bf16.mxu1 %v2753_v21  ;;  %v2752_v9 = vcombine.low %v1471_v12, %v1473_v6  ;;  %v603_v44 = vmax.f32 %v577_v47, 0.0  ;;  %v772_v21 = vshll.u32 %v4148_v30, 16  ;;  %v625_v18 = vpack.c.bf16 %v601_v23, %v601_v23 }
 0x1df   : > { %v1385_v36 = vsel %vm1371_vm6, %v4817_v33, %v1041_v14  ;;  %v1641_v11 = vsel %vm1461_vm8, %v1595_v42, %v1340_v39  ;;  %v1432_v26 = vsel %vm1416_vm7, %v1387_v16, %v4077_v3  ;;  %v4240_v41 = vor.u32 %v984_v10, %v980_v62 }
 0x1e0   : > { %1269 = vrot.lane.b32.xlu0 %v4188_v48, %s3323_s21  ;;  %1152 = vrot.lane.b32.xlu1 %v4160_v4, %s3322_s20  ;;  %v1430_v22 = vsel %vm1416_vm7, %v1385_v36, %v4079_v60  ;;  %v2756_v54 = vcombine.low %v1641_v11, %v1643_v25  ;;  %v627_v60 = vpack.c.bf16 %v603_v44, %v603_v44  ;;  %v845_v38 = vsel %vm3490_vm4, 0, %v788_v8 }
 0x1e1   : > { %v1475_v30 = vsel %vm1461_vm8, %v1430_v22, %v3989_v53  ;;  %v774_v47 = vor.u32 %v772_v21, %v771_v7  ;;  %v776_v14 = vshrl.u32 %v625_v18, 16  ;;  %v1477_v3 = vsel %vm1461_vm8, %v1432_v26, %v4095_v5 }
 0x1e2   : > { %v4220_v19 = vpop.permute.xlu0 %1136  ;;  %v4222_v27 = vpop.permute.xlu1 %1301  ;;  %v2755_v39 = vcombine.low %v1475_v30, %v1477_v3  ;;  %v790_v6 = vshrl.u32 %v627_v60, 16  ;;  %v4256_v56 = vor.u32 %v1005_v45, %v1001_v50  ;;  %v4261_v58 = vsel %vm3497_vm5, %v845_v38, 0 }
 0x1e3   : > { %2088 = vmatmul.mubr.bf16.gmra.mrb[8].mxu1 %v2752_v9  ;;  %v843_v46 = vsel %vm3490_vm4, 0, %v774_v47  ;;  %v778_v42 = vrot.slane %v776_v14, 7  ;;  %v779_v5 = vshll.u32 %v625_v18, 16  ;;  %v793_v23 = vshll.u32 %v627_v60, 16 }
 0x1e4   : > { %1359 = vrot.lane.b32.xlu0 %v4224_v63, %s3324_s22  ;;  %1148 = vrot.lane.b32.xlu1 %v4188_v48, %s3322_s20  ;;  %v792_v12 = vrot.slane %v790_v6, 7  ;;  %v987_v11 = vshrl.u32 %v4099_v61, 16  ;;  %v991_v9 = vrot.slane %v989_v0, 1  ;;  %v4276_v62 = vsel %vm3497_vm5, %v843_v46, 0 }
 0x1e5   : > { %2095 = vmatprep.mubr.bf16.mxu1 %v2756_v54  ;;  %v781_v10 = vor.u32 %v779_v5, %v778_v42  ;;  %v4287_v44 = vrot.slane %v4276_v62, 1  ;;  %v1024_v45 = vshll.u32 %v4261_v58, 16  ;;  %v1010_v59 = vshll.u32 %v4276_v62, 16 }
 0x1e6   : > { %v4236_v17 = vpop.permute.xlu0 %1185  ;;  %v4238_v1 = vpop.permute.xlu1 %1183  ;;  %v795_v24 = vor.u32 %v793_v23, %v792_v12  ;;  %v4289_v25 = vor.u32 %v991_v9, %v987_v11  ;;  %v1022_v6 = vshrl.u32 %v4261_v58, 16  ;;  %v1008_v23 = vshrl.u32 %v4276_v62, 16 }
 0x1e7   : > { %4820 = vst [vmem:[#allocation11_spill] sm:$0xff] %v4287_v44  ;;  %v844_v22 = vsel %vm3490_vm4, 0, %v781_v10  ;;  %v1026_v0 = vrot.slane %v1024_v45, 1  ;;  %v1012_v11 = vrot.slane %v1010_v59, 1  ;;  %v4828_v10 = vld [vmem:[#allocation8_spill] sm:$0xff] }
 0x1e8   : > { %1062 = vrot.lane.b32.xlu0 %v4224_v63, %s3323_s21  ;;  %1058 = vrot.lane.b32.xlu1 %v4240_v41, %s3323_s21  ;;  %v846_v54 = vsel %vm3490_vm4, 0, %v795_v24  ;;  %v4303_v21 = vsel %vm3497_vm5, %v844_v22, 0 }
 0x1e9   : > { %v4313_v26 = vsel %vm3497_vm5, %v846_v54, 0  ;;  %v4332_v3 = vrot.slane %v4303_v21, 1  ;;  %v4346_v12 = vor.u32 %v1026_v0, %v1022_v6 }
 0x1ea   : > { %v4252_v2 = vpop.permute.xlu0 %1299  ;;  %v4254_v53 = vpop.permute.xlu1 %1179  ;;  %4822 = vst [vmem:[#allocation7_spill] sm:$0xff] %v4313_v26  ;;  %v4784_v30 = vrot.slane %v4313_v26, 1 }
 0x1eb   : > { %2096 = vmatmul.mubr.bf16.gmra.mrb[12].mxu1 %v2755_v39  ;;  %4824 = vst [vmem:[#allocation13_spill] sm:$0xff] %v4332_v3  ;;  %v4335_v39 = vrot.slane %v4261_v58, 1 }
 0x1ec   : > { %1323 = vrot.lane.b32.xlu0 %v4261_v58, %s3322_s20  ;;  %1361 = vrot.lane.b32.xlu1 %v4256_v56, %s3324_s22 }
 0x1ed   : > { %4825 = vst [vmem:[#allocation23_spill] sm:$0xff] %v4335_v39 }
 0x1ee   : > { %v4269_v33 = vpop.permute.xlu0 %1132  ;;  %v4271_v36 = vpop.permute.xlu1 %1255 }
 0x1f0   : > { %1319 = vrot.lane.b32.xlu0 %v4276_v62, %s3322_s20  ;;  %1064 = vrot.lane.b32.xlu1 %v4256_v56, %s3323_s21 }
 0x1f2   : > { %v4282_v57 = vpop.permute.xlu0 %1181  ;;  %v4284_v16 = vpop.permute.xlu1 %1303 }
 0x1f4   : > { %1154 = vrot.lane.b32.xlu0 %v4287_v44, %s3322_s20  ;;  %1357 = vrot.lane.b32.xlu1 %v4289_v25, %s3324_s22 }
 0x1f6   : > { %v4299_v8 = vpop.permute.xlu0 %1257  ;;  %v1252_v7 = vpop.permute.xlu1 %1251 }
 0x1f8   : > { %v4305_v18 = vpop.f32.mrb[24].mxu0  ;;  %1205 = vrot.lane.b32.xlu0 %v4303_v21, %s3324_s22  ;;  %1060 = vrot.lane.b32.xlu1 %v4289_v25, %s3323_s21 }
 0x1f9   : > { %4821 = vst [vmem:[#allocation19_spill] sm:$0xff] %v4305_v18  ;;  %v4315_v51 = vpop.f32.mrb[25].mxu0  ;;  %v4833_v18 = vld [vmem:[#allocation18_spill] sm:$0xff] }
 0x1fa   : > { %v4317_v50 = vpop.f32.mrb[26].mxu0  ;;  %v1254_v60 = vpop.permute.xlu0 %1253 }
 0x1fb   : > { %4823 = vst [vmem:[#allocation6_spill] sm:$0xff] %v4317_v50  ;;  %v4321_v38 = vpop.permute.xlu1 %1138  ;;  %v4323_v47 = vpop.f32.mrb[27].mxu0  ;;  %v1539_v4 = vsel %vm1371_vm6, %v4833_v18, %v1254_v60 }
 0x1fc   : > { %1281 = vrot.lane.b32.xlu0 %v4784_v30, %s3323_s21  ;;  %1203 = vrot.lane.b32.xlu1 %v4276_v62, %s3324_s22  ;;  %v1601_v18 = vsel %vm1416_vm7, %v1539_v4, %v4222_v27  ;;  %v1479_v4 = vsel %vm1461_vm8, %v4006_v31, %v4254_v53 }
 0x1fe   : > { %v1346_v14 = vpop.permute.xlu0 %1345 }
 0x1ff   : > { %v4338_v46 = vpop.permute.xlu1 %1134 }
 0x200   : > { %1277 = vrot.lane.b32.xlu0 %v4332_v3, %s3323_s21  ;;  %1279 = vrot.lane.b32.xlu1 %v4335_v39, %s3323_s21  ;;  %v4344_v42 = vpop.f32.mrb[28].mxu0 }
 0x201   : > { %4826 = vst [vmem:[#allocation24_spill] sm:$0xff] %v4344_v42  ;;  %v4349_v9 = vpop.f32.mrb[29].mxu0 }
 0x202   : > { %v1049_v5 = vpop.permute.xlu0 %1048  ;;  %4827 = vst [vmem:[#allocation25_spill] sm:$0xff] %v4349_v9  ;;  %v4353_v54 = vpop.f32.mrb[30].mxu0 }
 0x203   : > { %v1393_v24 = vsel %vm1371_vm6, %v4828_v10, %v1049_v5  ;;  %v1045_v22 = vpop.permute.xlu1 %1044  ;;  %4829 = vst [vmem:[#allocation8_spill] sm:$0xff] %v4353_v54  ;;  %v4361_v6 = vpop.f32.mrb[31].mxu0  ;;  %v4369_v5 = vor.u32 %v1012_v11, %v1008_v23  ;;  %v1017_v10 = vshll.u32 %v4303_v21, 16  ;;  %v4831_v23 = vld [vmem:[#allocation12_spill] sm:$0xff] }
 0x204   : > { %v1438_v45 = vsel %vm1416_vm7, %v1393_v24, %v4220_v19  ;;  %1367 = vrot.lane.b32.xlu0 %v4346_v12, %s3324_s22  ;;  %1275 = vrot.lane.b32.xlu1 %v4287_v44, %s3323_s21  ;;  %4830 = vst [vmem:[#allocation26_spill] sm:$0xff] %v4361_v6  ;;  %v1015_v24 = vshrl.u32 %v4303_v21, 16  ;;  %v1389_v11 = vsel %vm1371_vm6, %v4831_v23, %v1045_v22  ;;  %v1228_v6 = vshll.u32 %v4313_v26, 16 }
 0x205   : > { %v4365_v59 = vsel %vm1461_vm8, %v1438_v45, %v4236_v17  ;;  %v1019_v54 = vrot.slane %v1017_v10, 1  ;;  %v4832_v10 = vld [vmem:[#allocation15_spill] sm:$0xff]  ;;  %v1434_v44 = vsel %vm1416_vm7, %v1389_v11, %v4269_v33  ;;  %v1226_v23 = vshrl.u32 %v4313_v26, 16 }
 0x206   : > { %v4367_v0 = vpop.permute.xlu0 %1309  ;;  %v1536_v50 = vsel %vm1371_vm6, %v4832_v10, %v1252_v7  ;;  %v1230_v7 = vrot.slane %v1228_v6, 1  ;;  %v1481_v11 = vsel %vm1461_vm8, %v1434_v44, %v4282_v57 }
 0x207   : > { %v4372_v30 = vpop.permute.xlu1 %1347  ;;  %v4389_v42 = vor.u32 %v1019_v54, %v1015_v24  ;;  %v1599_v33 = vsel %vm1416_vm7, %v1536_v50, %v4252_v2  ;;  %v2758_v50 = vcombine.low %v1479_v4, %v1481_v11 }
 0x208   : > { %1363 = vrot.lane.b32.xlu0 %v4369_v5, %s3324_s22  ;;  %1321 = vrot.lane.b32.xlu1 %v4303_v21, %s3322_s20  ;;  %v4428_v57 = vor.u32 %v1230_v7, %v1226_v23 }
 0x20a   : > { %v1306_v19 = vpop.permute.xlu0 %1305  ;;  %v4404_v22 = vpop.f32.mrb[32].mxu0 }
 0x20b   : > { %v4379_v17 = vpop.permute.xlu1 %1050  ;;  %4834 = vst [vmem:[#allocation12_spill] sm:$0xff] %v4404_v22  ;;  %v4406_v54 = vpop.f32.mrb[33].mxu0  ;;  %v1647_v22 = vsel %vm1461_vm8, %v1601_v18, %v1346_v14  ;;  %v4838_v14 = vld [vmem:[#allocation10_spill] sm:$0xff] }
 0x20c   : > { %1070 = vrot.lane.b32.xlu0 %v4346_v12, %s3323_s21  ;;  %1325 = vrot.lane.b32.xlu1 %v4313_v26, %s3322_s20  ;;  %4835 = vst [vmem:[#allocation15_spill] sm:$0xff] %v4406_v54  ;;  %v4409_v10 = vpop.f32.mrb[34].mxu0 }
 0x20d   : > { %4836 = vst [vmem:[#allocation18_spill] sm:$0xff] %v4409_v10  ;;  %v4417_v48 = vpop.f32.mrb[35].mxu0 }
 0x20e   : > { %v4387_v45 = vpop.permute.xlu0 %1193  ;;  %4837 = vst [vmem:[#allocation27_spill] sm:$0xff] %v4417_v48 }
 0x20f   : > { %v4392_v9 = vpop.permute.xlu1 %1191 }
 0x210   : > { %1066 = vrot.lane.b32.xlu0 %v4369_v5, %s3323_s21  ;;  %1365 = vrot.lane.b32.xlu1 %v4389_v42, %s3324_s22 }
 0x212   : > { %v1141_v24 = vpop.permute.xlu0 %1140 }
 0x213   : > { %v1344_v60 = vpop.permute.xlu1 %1343 }
 0x214   : > { %v1645_v54 = vsel %vm1461_vm8, %v1599_v33, %v1344_v60  ;;  %1156 = vrot.lane.b32.xlu0 %v4332_v3, %s3322_s20  ;;  %1158 = vrot.lane.b32.xlu1 %v4335_v39, %s3322_s20 }
 0x215   : > { %v2759_v27 = vcombine.low %v1645_v54, %v1647_v22 }
 0x216   : > { %v1190_v2 = vpop.permute.xlu0 %1189 }
 0x217   : > { %v1047_v44 = vpop.permute.xlu1 %1046  ;;  %2103 = vmatprep.mubr.bf16.mxu1 %v2759_v27 }
 0x218   : > { %v1391_v6 = vsel %vm1371_vm6, %v4838_v14, %v1047_v44  ;;  %2104 = vmatmul.mubr.bf16.gmra.mrb[16].mxu1 %v2758_v50  ;;  %1369 = vrot.lane.b32.xlu0 %v4428_v57, %s3324_s22  ;;  %v4839_v44 = vld [vmem:[#allocation14_spill] sm:$0xff] }
 0x219   : > { %v1436_v18 = vsel %vm1416_vm7, %v1391_v6, %v4338_v46  ;;  %1068 = vrot.lane.b32.xlu1 %v4389_v42, %s3323_s21 }
 0x21a   : > { %v1266_v53 = vpop.permute.xlu0 %1265  ;;  %v1483_v22 = vsel %vm1461_vm8, %v1436_v18, %v4238_v1  ;;  %v1542_v1 = vsel %vm1371_vm6, %v4839_v44, %v4271_v36 }
 0x21b   : > { %v1188_v54 = vpop.permute.xlu1 %1187  ;;  %v2761_v23 = vcombine.low %v1483_v22, %v4365_v59  ;;  %v4840_v59 = vld [vmem:[#allocation16_spill] sm:$0xff]  ;;  %v1603_v6 = vsel %vm1416_vm7, %v1542_v1, %v4284_v16  ;;  %v1557_v16 = vsel %vm1371_vm6, %v4057_v52, %v1266_v53 }
 0x21c   : > { %1209 = vrot.lane.b32.xlu0 %v4313_v26, %s3324_s22  ;;  %v1545_v14 = vsel %vm1371_vm6, %v4840_v59, %v4299_v8  ;;  %v1649_v10 = vsel %vm1461_vm8, %v1603_v6, %v4372_v30 }
 0x21d   : > { %1207 = vrot.lane.b32.xlu1 %v4261_v58, %s3324_s22  ;;  %v1605_v18 = vsel %vm1416_vm7, %v1545_v14, %v1306_v19 }
 0x21e   : > { %v1262_v7 = vpop.permute.xlu0 %1261 }
 0x21f   : > { %v1264_v33 = vpop.permute.xlu1 %1263  ;;  %v1551_v30 = vsel %vm1371_vm6, %v4069_v29, %v1262_v7  ;;  %v3230_v29 = vld [vmem:[%s4765_s5] sm:$0xff]  }
 0x220   : > { %3110 = vmatprep.subr.bf16.mxu0 %v3230_v29 }
 0x221   : > { %3111 = vmatpush3.bf16.msra.mxu0 %v3230_v29 }
 0x222   : > { %v1143_v60 = vpop.permute.xlu0 %1142 }
 0x223   : > { %v1312_v46 = vpop.permute.xlu1 %1311 }
 0x226   : > { %v1354_v11 = vpop.permute.xlu0 %1353 }
 0x227   : > { %v1145_v4 = vpop.permute.xlu1 %1144 }
 0x22a   : > { %v1057_v27 = vpop.permute.xlu0 %1056 }
 0x22b   : > { %v1260_v50 = vpop.permute.xlu1 %1259 }
 0x22c   : > { %v1548_v52 = vsel %vm1371_vm6, %v4027_v40, %v1260_v50 }
 0x22e   : > { %v1350_v22 = vpop.permute.xlu0 %1349 }
 0x22f   : > { %v1651_v48 = vsel %vm1461_vm8, %v1605_v18, %v1350_v22  ;;  %v1308_v26 = vpop.permute.xlu1 %1307 }
 0x230   : > { %v2762_v3 = vcombine.low %v1649_v10, %v1651_v48  ;;  %v4841_v48 = vld [vmem:[#allocation9_spill] sm:$0xff]  ;;  %v1612_v10 = vsel %vm1416_vm7, %v1557_v16, %v4146_v13  ;;  %v1607_v53 = vsel %vm1416_vm7, %v1548_v52, %v1308_v26 }
 0x231   : > { %v1658_v26 = vsel %vm1461_vm8, %v1612_v10, %v4819_v37 }
 0x232   : > { %v1053_v39 = vpop.permute.xlu0 %1052  ;;  %2111 = vmatprep.mubr.bf16.mxu1 %v2762_v3  ;;  %v1395_v3 = vsel %vm1371_vm6, %v4841_v48, %v4379_v17  ;;  %v1609_v17 = vsel %vm1416_vm7, %v1551_v30, %v4367_v0 }
 0x233   : > { %v4457_v36 = vpop.permute.xlu1 %1315  ;;  %2112 = vmatmul.mubr.bf16.gmra.mrb[20].mxu1 %v2761_v23  ;;  %v1397_v8 = vsel %vm1371_vm6, %v3712_v43, %v1053_v39  ;;  %v1554_v43 = vsel %vm1371_vm6, %v3991_v28, %v1264_v33  ;;  %v1440_v28 = vsel %vm1416_vm7, %v1395_v3, %v4321_v38  ;;  %v1655_v40 = vsel %vm1461_vm8, %v1609_v17, %v1354_v11  ;;  %v3231_v38 = vld [vmem:[%s4765_s5 + $0x8] sm:$0xff]  }
 0x234   : > { %v1442_v1 = vsel %vm1416_vm7, %v1397_v8, %v1141_v24  ;;  %v1611_v24 = vsel %vm1416_vm7, %v1554_v43, %v1312_v46  ;;  %v1487_v46 = vsel %vm1461_vm8, %v1440_v28, %v1188_v54  ;;  %3112 = vmatprep.subr.bf16.mxu0 %v3231_v38 }
 0x235   : > { %v1489_v7 = vsel %vm1461_vm8, %v1442_v1, %v1190_v2  ;;  %v4842_v2 = vld [vmem:[#allocation17_spill] sm:$0xff]  ;;  %3113 = vmatpush3.bf16.msra.mxu0 %v3231_v38 }
 0x236   : > { %v1356_v44 = vpop.permute.xlu0 %1355  ;;  %v2764_v14 = vcombine.low %v1487_v46, %v1489_v7  ;;  %v1401_v11 = vsel %vm1371_vm6, %v4842_v2, %v1057_v27 }
 0x237   : > { %v4463_v19 = vpop.permute.xlu1 %1199  ;;  %v1657_v33 = vsel %vm1461_vm8, %v1611_v24, %v1356_v44  ;;  %v1446_v8 = vsel %vm1416_vm7, %v1401_v11, %v1145_v4 }
 0x238   : > { %v2768_v6 = vcombine.low %v1657_v33, %v1658_v26  ;;  %v1493_v27 = vsel %vm1461_vm8, %v1446_v8, %v4387_v45 }
 0x23a   : > { %v4477_v39 = vpop.permute.xlu0 %1150 }
 0x23b   : > { %v1352_v23 = vpop.permute.xlu1 %1351 }
 0x23c   : > { %v1653_v50 = vsel %vm1461_vm8, %v1607_v53, %v1352_v23 }
 0x23d   : > { %v2765_v59 = vcombine.low %v1653_v50, %v1655_v40 }
 0x23e   : > { %v1202_v0 = vpop.permute.xlu0 %1201 }
 0x23f   : > { %v1055_v18 = vpop.permute.xlu1 %1054  ;;  %2119 = vmatprep.mubr.bf16.mxu1 %v2765_v59 }
 0x240   : > { %v1399_v54 = vsel %vm1371_vm6, %v3940_v49, %v1055_v18  ;;  %2120 = vmatmul.mubr.bf16.gmra.mrb[24].mxu1 %v2764_v14 }
 0x241   : > { %v1444_v22 = vsel %vm1416_vm7, %v1399_v54, %v1143_v60  ;;  %2127 = vmatprep.mubr.bf16.mxu1 %v2768_v6 }
 0x242   : > { %v1314_v44 = vpop.permute.xlu0 %1313  ;;  %v1491_v30 = vsel %vm1461_vm8, %v1444_v22, %v4392_v9 }
 0x243   : > { %v1196_v16 = vpop.permute.xlu1 %1195  ;;  %v2767_v48 = vcombine.low %v1491_v30, %v1493_v27 }
 0x246   : > { %v1147_v1 = vpop.permute.xlu0 %1146 }
 0x247   : > { %v1272_v3 = vpop.permute.xlu1 %1271 }
 0x248   : > { %2128 = vmatmul.mubr.bf16.gmra.mrb[28].mxu1 %v2767_v48 }
 0x24a   : > { %v1198_v49 = vpop.permute.xlu0 %1197 }
 0x24b   : > { %v1318_v10 = vpop.permute.xlu1 %1317 }
 0x24e   : > { %v1274_v43 = vpop.permute.xlu0 %1273 }
 0x24f   : > { %v1268_v60 = vpop.permute.xlu1 %1267 }
 0x250   : > { %v1560_v40 = vsel %vm1371_vm6, %v4240_v41, %v1268_v60 }
 0x251   : > { %v1614_v26 = vsel %vm1416_vm7, %v1560_v40, %v1314_v44 }
 0x252   : > { %v1270_v52 = vpop.permute.xlu0 %1269 }
 0x253   : > { %v1153_v29 = vpop.permute.xlu1 %1152  ;;  %v1563_v33 = vsel %vm1371_vm6, %v4289_v25, %v1270_v52  ;;  %v1495_v25 = vsel %vm1461_vm8, %v4006_v31, %v1196_v16 }
 0x254   : > { %v1616_v59 = vsel %vm1416_vm7, %v1563_v33, %v4457_v36 }
 0x256   : > { %v1360_v24 = vpop.permute.xlu0 %1359 }
 0x257   : > { %v1149_v4 = vpop.permute.xlu1 %1148 }
 0x25a   : > { %v1063_v17 = vpop.permute.xlu0 %1062 }
 0x25b   : > { %v1059_v53 = vpop.permute.xlu1 %1058  ;;  %v1407_v2 = vsel %vm1371_vm6, %v4046_v35, %v1063_v17 }
 0x25c   : > { %v1403_v9 = vsel %vm1371_vm6, %v4103_v15, %v1059_v53  ;;  %v1662_v15 = vsel %vm1461_vm8, %v1616_v59, %v1360_v24  ;;  %v1452_v36 = vsel %vm1416_vm7, %v1407_v2, %v4477_v39 }
 0x25d   : > { %v1448_v50 = vsel %vm1416_vm7, %v1403_v9, %v1147_v1  ;;  %v1501_v31 = vsel %vm1461_vm8, %v1452_v36, %v1202_v0 }
 0x25e   : > { %v1324_v23 = vpop.permute.xlu0 %1323  ;;  %v1497_v38 = vsel %vm1461_vm8, %v1448_v50, %v1198_v49  ;;  %v1566_v49 = vsel %vm1371_vm6, %v4224_v63, %v1272_v3 }
 0x25f   : > { %v1362_v7 = vpop.permute.xlu1 %1361  ;;  %v2770_v18 = vcombine.low %v1495_v25, %v1497_v38  ;;  %v1618_v60 = vsel %vm1416_vm7, %v1566_v49, %v1318_v10 }
 0x262   : > { %v1320_v45 = vpop.permute.xlu0 %1319 }
 0x263   : > { %v1065_v28 = vpop.permute.xlu1 %1064 }
 0x266   : > { %v1155_v46 = vpop.permute.xlu0 %1154 }
 0x267   : > { %v1358_v14 = vpop.permute.xlu1 %1357 }
 0x268   : > { %v1660_v41 = vsel %vm1461_vm8, %v1614_v26, %v1358_v14 }
 0x269   : > { %v2771_v11 = vcombine.low %v1660_v41, %v1662_v15 }
 0x26a   : > { %v1206_v6 = vpop.permute.xlu0 %1205 }
 0x26b   : > { %v1061_v54 = vpop.permute.xlu1 %1060  ;;  %2135 = vmatprep.mubr.bf16.mxu1 %v2771_v11 }
 0x26c   : > { %v1405_v22 = vsel %vm1371_vm6, %v4099_v61, %v1061_v54  ;;  %2136 = vmatmul.mubr.bf16.gmra.mrb[32].mxu1 %v2770_v18  ;;  %v1569_v61 = vsel %vm1371_vm6, %v4256_v56, %v1274_v43  ;;  %v1409_v56 = vsel %vm1371_vm6, %v4083_v20, %v1065_v28 }
 0x26d   : > { %v1450_v8 = vsel %vm1416_vm7, %v1405_v22, %v1149_v4  ;;  %v1620_v52 = vsel %vm1416_vm7, %v1569_v61, %v1320_v45  ;;  %v1454_v33 = vsel %vm1416_vm7, %v1409_v56, %v1153_v29  ;;  %v4577_v22 = vld [vmem:[%s4764_s4] ss:$0 sm:$0xff] }
 0x26e   : > { %v1282_v35 = vpop.permute.xlu0 %1281  ;;  %v1499_v44 = vsel %vm1461_vm8, %v1450_v8, %v4463_v19  ;;  %v1664_v19 = vsel %vm1461_vm8, %v1618_v60, %v1362_v7 }
 0x26f   : > { %v1204_v16 = vpop.permute.xlu1 %1203  ;;  %v2773_v30 = vcombine.low %v1499_v44, %v1501_v31 }
 0x270   : > { %v1503_v28 = vsel %vm1461_vm8, %v1454_v33, %v1204_v16 }
 0x272   : > { %v1278_v27 = vpop.permute.xlu0 %1277 }
 0x273   : > { %v1280_v1 = vpop.permute.xlu1 %1279  ;;  %v1575_v63 = vsel %vm1371_vm6, %v4389_v42, %v1278_v27  ;;  %v4843_v27 = vld [vmem:[#allocation20_spill] sm:$0xff] }
 0x274   : > { %v1624_v43 = vsel %vm1416_vm7, %v1575_v63, %v1324_v23 }
 0x276   : > { %v1368_v48 = vpop.permute.xlu0 %1367 }
 0x277   : > { %v1276_v39 = vpop.permute.xlu1 %1275  ;;  %v1670_v50 = vsel %vm1461_vm8, %v1624_v43, %v1368_v48 }
 0x278   : > { %v1572_v3 = vsel %vm1371_vm6, %v4369_v5, %v1276_v39  ;;  %v1581_v5 = vsel %vm1371_vm6, %v4428_v57, %v1282_v35 }
 0x279   : > { %v1627_v29 = vsel %vm1416_vm7, %v1581_v5, %v4146_v13  ;;  %v4854_v5 = vld [vmem:[#allocation6_spill] sm:$0xff] }
 0x27a   : > { %v1364_v24 = vpop.permute.xlu0 %1363  ;;  %v1673_v57 = vsel %vm1461_vm8, %v1627_v29, %v4819_v37 }
 0x27b   : > { %v1666_v0 = vsel %vm1461_vm8, %v1620_v52, %v1364_v24  ;;  %v1322_v4 = vpop.permute.xlu1 %1321  ;;  %v4844_v52 = vld [vmem:[#allocation5_spill] sm:$0xff]  ;;  %v4845_v24 = vrot.slane %v3920_v55, 1  ;;  %v4851_v55 = vld [vmem:[#allocation7_spill] sm:$0xff] }
 0x27c   : > { %v2774_v17 = vcombine.low %v1664_v19, %v1666_v0  ;;  %v1622_v7 = vsel %vm1416_vm7, %v1572_v3, %v1322_v4  ;;  %v4846_v4 = vld [vmem:[#allocation22_spill] sm:$0xff]  ;;  %v4852_v56 = vrot.slane %v4851_v55, 1 }
 0x27d   : > { %v2769_v19 = vcombine.low %v4845_v24, %v4844_v52 }
 0x27e   : > { %v1071_v53 = vpop.permute.xlu0 %1070  ;;  %2143 = vmatprep.mubr.bf16.mxu1 %v2774_v17  ;;  %v2772_v17 = vcombine.low %v4846_v4, %v4067_v34  ;;  %v2781_v34 = vcombine.low %v4852_v56, %v4844_v52  ;;  %v4859_v4 = vld [vmem:[#allocation15_spill] sm:$0xff] }
 0x27f   : > { %v1326_v9 = vpop.permute.xlu1 %1325  ;;  %2144 = vmatmul.mubr.bf16.gmra.mrb[36].mxu1 %v2773_v30  ;;  %v1415_v13 = vsel %vm1371_vm6, %v4261_v58, %v1071_v53 }
 0x282   : > { %v1067_v10 = vpop.permute.xlu0 %1066 }
 0x283   : > { %v1411_v45 = vsel %vm1371_vm6, %v4276_v62, %v1067_v10  ;;  %v1366_v40 = vpop.permute.xlu1 %1365 }
 0x284   : > { %v1456_v42 = vsel %vm1416_vm7, %v1411_v45, %v1155_v46  ;;  %v1668_v20 = vsel %vm1461_vm8, %v1622_v7, %v1366_v40  ;;  %v1578_v46 = vsel %vm1371_vm6, %v4346_v12, %v1280_v1  ;;  %v2766_v1 = vcombine.low %v4843_v27, %v3962_v32  ;;  %v4847_v32 = vld [vmem:[#allocation11_spill] sm:$0xff] }
 0x285   : > { %v2777_v23 = vcombine.low %v1668_v20, %v1670_v50  ;;  %v1505_v59 = vsel %vm1461_vm8, %v1456_v42, %v1206_v6  ;;  %v1626_v38 = vsel %vm1416_vm7, %v1578_v46, %v1326_v9  ;;  %v4850_v9 = vld [vmem:[#allocation13_spill] sm:$0xff]  ;;  %v4853_v50 = vld [vmem:[#allocation19_spill] sm:$0xff] }
 0x286   : > { %v1157_v26 = vpop.permute.xlu0 %1156  ;;  %v2776_v14 = vcombine.low %v1503_v28, %v1505_v59 }
 0x287   : > { %v1159_v62 = vpop.permute.xlu1 %1158  ;;  %2151 = vmatprep.mubr.bf16.mxu1 %v2777_v23 }
 0x288   : > { %2152 = vmatmul.mubr.bf16.gmra.mrb[40].mxu1 %v2776_v14  ;;  %v1460_v6 = vsel %vm1416_vm7, %v1415_v13, %v1159_v62 }
 0x28a   : > { %v1370_v15 = vpop.permute.xlu0 %1369 }
 0x28b   : > { %v1672_v2 = vsel %vm1461_vm8, %v1626_v38, %v1370_v15  ;;  %v1069_v41 = vpop.permute.xlu1 %1068 }
 0x28c   : > { %v2780_v25 = vcombine.low %v1672_v2, %v1673_v57  ;;  %v1413_v11 = vsel %vm1371_vm6, %v4303_v21, %v1069_v41  ;;  %v4855_v2 = vld [vmem:[#allocation25_spill] sm:$0xff] }
 0x28d   : > { %v1458_v54 = vsel %vm1416_vm7, %v1413_v11, %v1157_v26  ;;  %v4856_v11 = vld [vmem:[#allocation26_spill] sm:$0xff] }
 0x28e   : > { %v1210_v18 = vpop.permute.xlu0 %1209  ;;  %v2942_v12 = vpop.f32.mrb[0].mxu1  ;;  %2159 = vmatprep.mubr.bf16.mxu1 %v2780_v25 }
 0x28f   : > { %v1509_v36 = vsel %vm1461_vm8, %v1460_v6, %v1210_v18  ;;  %v1208_v37 = vpop.permute.xlu1 %1207  ;;  %v2943_v8 = vpop.f32.mrb[1].mxu1 }
 0x290   : > { %v1507_v21 = vsel %vm1461_vm8, %v1458_v54, %v1208_v37  ;;  %v2944_v35 = vadd.f32 %v2943_v8, %v2942_v12  ;;  %v2945_v58 = vpop.f32.mrb[2].mxu1 }
 0x291   : > { %v2779_v44 = vcombine.low %v1507_v21, %v1509_v36  ;;  %v2946_v31 = vpop.f32.mrb[3].mxu1 }
 0x292   : > { %v2074_v16 = vadd.f32 %v2944_v35, %v4577_v22  ;;  %v2947_v30 = vadd.f32 %v2946_v31, %v2945_v58 }
 0x293   : > { %2160 = vmatmul.mubr.bf16.gmra.mrb[44].mxu1 %v2779_v44  ;;  %v4857_v44 = vld [vmem:[#allocation24_spill] sm:$0xff] }
 0x294   : > { %v2203_v48 = vadd.f32 %v4315_v51, %v2074_v16  ;;  %v2077_v39 = vadd.f32 %v2947_v30, %v4577_v22  ;;  %3098 = vmatprep.mubr.msk.bf16.mxu1 %vm1371_vm6, %v2766_v1  ;;  %v4848_v51 = vld [vmem:[#allocation21_spill] sm:$0xff]  ;;  %v4858_v30 = vld [vmem:[#allocation8_spill] sm:$0xff] }
 0x295   : > { %v2775_v53 = vcombine.low %v4848_v51, %v4847_v32  ;;  %v4860_v51 = vld [vmem:[#allocation27_spill] sm:$0xff] }
 0x296   : > { %v2206_v49 = vadd.f32 %v4323_v47, %v2077_v39  ;;  %v2297_v61 = vmax.f32 %v2203_v48, 0.0  ;;  %v4849_v47 = vld [vmem:[#allocation23_spill] sm:$0xff] }
 0x297   : > { %v2778_v63 = vcombine.low %v4850_v9, %v4849_v47 }
 0x298   : > { %v2298_v60 = vmax.f32 %v2206_v49, 0.0 }
 0x29a   : > { %v2321_v0 = vpack.c.bf16 %v2298_v60, %v2297_v61 }
 0x29b   : > { %3099 = vmatmul.mubr.msk.bf16.vlgmr.msra.gmra.mrb[48].mxu1 %vm1371_vm6, %v2769_v19 }
 0x29c   : > { %3102 = vmatprep.mubr.msk.bf16.mxu1 %vm1371_vm6, %v2772_v17  ;;  %3114 = vmatprep.mubr.msk.bf16.mxu0 %vm1371_vm6, %v2321_v0 }
 0x2a3   : > { %3103 = vmatmul.mubr.msk.bf16.gmra.mrb[52].mxu1 %vm1371_vm6, %v2775_v53 }
 0x2a4   : > { %3106 = vmatprep.mubr.msk.bf16.mxu1 %vm1371_vm6, %v2778_v63 }
 0x2ab   : > { %3107 = vmatmul.mubr.msk.bf16.gmra.mrb[56].mxu1 %vm1371_vm6, %v2781_v34 }
 0x2ae   : > { %v2948_v3 = vpop.f32.mrb[4].mxu1 }
 0x2af   : > { %v2949_v10 = vpop.f32.mrb[5].mxu1 }
 0x2b0   : > { %v2950_v43 = vadd.f32 %v2949_v10, %v2948_v3  ;;  %v2951_v7 = vpop.f32.mrb[6].mxu1 }
 0x2b1   : > { %v2952_v45 = vpop.f32.mrb[7].mxu1 }
 0x2b2   : > { %v2082_v40 = vadd.f32 %v2950_v43, %v4577_v22  ;;  %v2953_v33 = vadd.f32 %v2952_v45, %v2951_v7  ;;  %v4861_v45 = vld [vmem:[#allocation12_spill] sm:$0xff] }
 0x2b4   : > { %v2211_v42 = vadd.f32 %v4853_v50, %v2082_v40  ;;  %v2085_v20 = vadd.f32 %v2953_v33, %v4577_v22  ;;  %v4862_v50 = vld [vmem:[#allocation18_spill] sm:$0xff] }
 0x2b6   : > { %v2214_v28 = vadd.f32 %v4854_v5, %v2085_v20  ;;  %v2954_v23 = vpop.f32.mrb[8].mxu1  ;;  %v2299_v26 = vmax.f32 %v2211_v42, 0.0 }
 0x2b7   : > { %v2955_v59 = vpop.f32.mrb[9].mxu1 }
 0x2b8   : > { %v2300_v14 = vmax.f32 %v2214_v28, 0.0  ;;  %v2956_v62 = vadd.f32 %v2955_v59, %v2954_v23  ;;  %v2957_v29 = vpop.f32.mrb[10].mxu1 }
 0x2b9   : > { %v2958_v46 = vpop.f32.mrb[11].mxu1 }
 0x2ba   : > { %v2322_v38 = vpack.c.bf16 %v2300_v14, %v2299_v26  ;;  %v2090_v15 = vadd.f32 %v2956_v62, %v4577_v22  ;;  %v2959_v57 = vadd.f32 %v2958_v46, %v2957_v29 }
 0x2bc   : > { %v2219_v41 = vadd.f32 %v4855_v2, %v2090_v15  ;;  %v2093_v25 = vadd.f32 %v2959_v57, %v4577_v22  ;;  %3115 = vmatmul.mubr.msk.bf16.vlgmr.msra.gmra.mrb[36].mxu0 %vm1371_vm6, %v2322_v38 }
 0x2be   : > { %v2222_v13 = vadd.f32 %v4856_v11, %v2093_v25  ;;  %v2960_v6 = vpop.f32.mrb[12].mxu1  ;;  %v2301_v12 = vmax.f32 %v2219_v41, 0.0 }
 0x2bf   : > { %v2961_v18 = vpop.f32.mrb[13].mxu1 }
 0x2c0   : > { %v2302_v36 = vmax.f32 %v2222_v13, 0.0  ;;  %v2962_v54 = vadd.f32 %v2961_v18, %v2960_v6  ;;  %v2963_v37 = vpop.f32.mrb[14].mxu1 }
 0x2c1   : > { %v2964_v8 = vpop.f32.mrb[15].mxu1 }
 0x2c2   : > { %v2323_v21 = vpack.c.bf16 %v2302_v36, %v2301_v12  ;;  %v2098_v35 = vadd.f32 %v2962_v54, %v4577_v22  ;;  %v2965_v58 = vadd.f32 %v2964_v8, %v2963_v37 }
 0x2c4   : > { %v2227_v31 = vadd.f32 %v4857_v44, %v2098_v35  ;;  %v2101_v16 = vadd.f32 %v2965_v58, %v4577_v22  ;;  %3118 = vmatprep.mubr.msk.bf16.mxu0 %vm1371_vm6, %v2323_v21 }
 0x2c6   : > { %v2230_v27 = vadd.f32 %v4858_v30, %v2101_v16  ;;  %v2303_v1 = vmax.f32 %v2227_v31, 0.0 }
 0x2c8   : > { %v2304_v48 = vmax.f32 %v2230_v27, 0.0 }
 0x2ca   : > { %v2324_v39 = vpack.c.bf16 %v2304_v48, %v2303_v1 }
 0x2cc   : > { %3119 = vmatmul.mubr.msk.bf16.gmra.mrb[40].mxu0 %vm1371_vm6, %v2324_v39 }
 0x2eb   : > { %v2966_v49 = vpop.f32.mrb[16].mxu1 }
 0x2ec   : > { %v2967_v61 = vpop.f32.mrb[17].mxu1 }
 0x2ed   : > { %v2968_v60 = vadd.f32 %v2967_v61, %v2966_v49  ;;  %v2969_v52 = vpop.f32.mrb[18].mxu1 }
 0x2ee   : > { %v2970_v24 = vpop.f32.mrb[19].mxu1 }
 0x2ef   : > { %v2106_v19 = vadd.f32 %v2968_v60, %v4577_v22  ;;  %v2971_v0 = vadd.f32 %v2970_v24, %v2969_v52 }
 0x2f1   : > { %v2235_v17 = vadd.f32 %v4859_v4, %v2106_v19  ;;  %v2109_v32 = vadd.f32 %v2971_v0, %v4577_v22 }
 0x2f3   : > { %v2238_v53 = vadd.f32 %v4860_v51, %v2109_v32  ;;  %v2305_v47 = vmax.f32 %v2235_v17, 0.0 }
 0x2f5   : > { %v2306_v9 = vmax.f32 %v2238_v53, 0.0 }
 0x2f7   : > { %v2325_v63 = vpack.c.bf16 %v2306_v9, %v2305_v47 }
 0x2f9   : > { %3122 = vmatprep.mubr.msk.bf16.mxu0 %vm1371_vm6, %v2325_v63 }
 0x306   : > { %v2972_v55 = vpop.f32.mrb[20].mxu1 }
 0x307   : > { %v2973_v56 = vpop.f32.mrb[21].mxu1 }
 0x308   : > { %v2974_v34 = vadd.f32 %v2973_v56, %v2972_v55  ;;  %v2975_v3 = vpop.f32.mrb[22].mxu1 }
 0x309   : > { %v2976_v10 = vpop.f32.mrb[23].mxu1 }
 0x30a   : > { %v2114_v43 = vadd.f32 %v2974_v34, %v4577_v22  ;;  %v2977_v7 = vadd.f32 %v2976_v10, %v2975_v3 }
 0x30c   : > { %v2243_v40 = vadd.f32 %v4861_v45, %v2114_v43  ;;  %v2117_v33 = vadd.f32 %v2977_v7, %v4577_v22 }
 0x30e   : > { %v2246_v42 = vadd.f32 %v4862_v50, %v2117_v33  ;;  %v2307_v20 = vmax.f32 %v2243_v40, 0.0 }
 0x310   : > { %v2308_v5 = vmax.f32 %v2246_v42, 0.0 }
 0x312   : > { %v2326_v28 = vpack.c.bf16 %v2308_v5, %v2307_v20 }
 0x313   : > { %v2978_v23 = vpop.f32.mrb[24].mxu1 }
 0x314   : > { %v2979_v59 = vpop.f32.mrb[25].mxu1  ;;  %3123 = vmatmul.mubr.msk.bf16.gmra.mrb[44].mxu0 %vm1371_vm6, %v2326_v28 }
 0x315   : > { %v2980_v26 = vadd.f32 %v2979_v59, %v2978_v23  ;;  %v2981_v14 = vpop.f32.mrb[26].mxu1 }
 0x316   : > { %v2982_v62 = vpop.f32.mrb[27].mxu1 }
 0x317   : > { %v2983_v29 = vadd.f32 %v2982_v62, %v2981_v14  ;;  %v2122_v19 = vadd.f32 %v2980_v26, %v4577_v22 }
 0x319   : > { %v2125_v53 = vadd.f32 %v2983_v29, %v4577_v22 }
 0x31b   : > { %v2984_v46 = vpop.f32.mrb[28].mxu1 }
 0x31c   : > { %v2985_v38 = vpop.f32.mrb[29].mxu1 }
 0x31d   : > { %v2986_v15 = vadd.f32 %v2985_v38, %v2984_v46  ;;  %v2987_v57 = vpop.f32.mrb[30].mxu1 }
 0x31e   : > { %v2988_v2 = vpop.f32.mrb[31].mxu1 }
 0x31f   : > { %v2989_v41 = vadd.f32 %v2988_v2, %v2987_v57  ;;  %v2130_v52 = vadd.f32 %v2986_v15, %v4577_v22 }
 0x321   : > { %v2133_v17 = vadd.f32 %v2989_v41, %v4577_v22 }
 0x33f   : > { %v2990_v25 = vpop.f32.mrb[32].mxu1 }
 0x340   : > { %v2991_v11 = vpop.f32.mrb[33].mxu1 }
 0x341   : > { %v2992_v13 = vadd.f32 %v2991_v11, %v2990_v25  ;;  %v2993_v6 = vpop.f32.mrb[34].mxu1 }
 0x342   : > { %v2994_v18 = vpop.f32.mrb[35].mxu1 }
 0x343   : > { %v2995_v12 = vadd.f32 %v2994_v18, %v2993_v6  ;;  %v2138_v40 = vadd.f32 %v2992_v13, %v4577_v22 }
 0x345   : > { %v2141_v28 = vadd.f32 %v2995_v12, %v4577_v22 }
 0x352   : > { %v2996_v36 = vpop.f32.mrb[36].mxu1 }
 0x353   : > { %v2997_v54 = vpop.f32.mrb[37].mxu1 }
 0x354   : > { %v2998_v37 = vadd.f32 %v2997_v54, %v2996_v36  ;;  %v2999_v8 = vpop.f32.mrb[38].mxu1 }
 0x355   : > { %v3000_v21 = vpop.f32.mrb[39].mxu1 }
 0x356   : > { %v3001_v35 = vadd.f32 %v3000_v21, %v2999_v8  ;;  %v2146_v43 = vadd.f32 %v2998_v37, %v4577_v22 }
 0x358   : > { %v2149_v42 = vadd.f32 %v3001_v35, %v4577_v22 }
 0x35b   : > { %v3002_v58 = vpop.f32.mrb[40].mxu1 }
 0x35c   : > { %v3003_v44 = vpop.f32.mrb[41].mxu1 }
 0x35d   : > { %v3004_v31 = vadd.f32 %v3003_v44, %v3002_v58  ;;  %v3005_v16 = vpop.f32.mrb[42].mxu1 }
 0x35e   : > { %v3006_v30 = vpop.f32.mrb[43].mxu1 }
 0x35f   : > { %v3007_v27 = vadd.f32 %v3006_v30, %v3005_v16  ;;  %v2154_v41 = vadd.f32 %v3004_v31, %v4577_v22  ;;  %v3245_v16 = vld [vmem:[%s3428_s23 + $0x8] sm:$0xff]  }
 0x360   : > { %v2523_v30 = vunpack.c.l.bf16 %v3245_v16 }
 0x361   : > { %v2157_v12 = vadd.f32 %v3007_v27, %v4577_v22  ;;  %v3246_v27 = vld [vmem:[%s3428_s23] sm:$0xff]  }
 0x366   : > { %v3008_v1 = vpop.f32.mrb[44].mxu1 }
 0x367   : > { %v3009_v48 = vpop.f32.mrb[45].mxu1 }
 0x368   : > { %v3010_v39 = vadd.f32 %v3009_v48, %v3008_v1  ;;  %v3011_v49 = vpop.f32.mrb[46].mxu1  ;;  %v2521_v1 = vunpack.c.l.bf16 %v3246_v27 }
 0x369   : > { %v3012_v61 = vpop.f32.mrb[47].mxu1 }
 0x36a   : > { %v3013_v60 = vadd.f32 %v3012_v61, %v3011_v49  ;;  %v2162_v15 = vadd.f32 %v3010_v39, %v4577_v22  ;;  %v2524_v61 = vunpack.c.h.bf16 %v3245_v16 }
 0x36c   : > { %v2165_v13 = vadd.f32 %v3013_v60, %v4577_v22  ;;  %v4651_v22 = vld [vmem:[%s4766_s6] ss:$0 sm:$0xff]  ;;  %v2522_v60 = vunpack.c.h.bf16 %v3246_v27 }
 0x36e   : > { %v3100_v24 = vpop.f32.mrb[48].mxu1 }
 0x36f   : > { %v2259_v0 = vadd.f32 %v3100_v24, %v2130_v52  ;;  %v2250_v4 = vpop.f32.mrb[49].mxu1 }
 0x370   : > { %v2251_v32 = vadd.f32 %v2250_v4, %v2122_v19  ;;  %v3101_v51 = vpop.f32.mrb[50].mxu1 }
 0x371   : > { %v2262_v47 = vadd.f32 %v3101_v51, %v2133_v17  ;;  %v2253_v9 = vpop.f32.mrb[51].mxu1  ;;  %v2311_v55 = vmax.f32 %v2259_v0, 0.0 }
 0x372   : > { %v2254_v63 = vadd.f32 %v2253_v9, %v2125_v53  ;;  %v2309_v34 = vmax.f32 %v2251_v32, 0.0 }
 0x373   : > { %v2312_v56 = vmax.f32 %v2262_v47, 0.0 }
 0x374   : > { %v2310_v3 = vmax.f32 %v2254_v63, 0.0 }
 0x375   : > { %v2328_v10 = vpack.c.bf16 %v2312_v56, %v2311_v55 }
 0x376   : > { %v2327_v7 = vpack.c.bf16 %v2310_v3, %v2309_v34  ;;  %v3104_v45 = vpop.f32.mrb[52].mxu1  ;;  %v3247_v3 = vld [vmem:[%s3428_s23 + $0x18] sm:$0xff]  }
 0x377   : > { %v2275_v33 = vadd.f32 %v3104_v45, %v2146_v43  ;;  %v2266_v50 = vpop.f32.mrb[53].mxu1 }
 0x378   : > { %v2267_v20 = vadd.f32 %v2266_v50, %v2138_v40  ;;  %v3105_v5 = vpop.f32.mrb[54].mxu1  ;;  %3126 = vmatprep.mubr.msk.bf16.mxu0 %vm1371_vm6, %v2327_v7  ;;  %v3248_v7 = vld [vmem:[%s3428_s23 + $0x10] sm:$0xff]   ;;  %v2528_v50 = vunpack.c.h.bf16 %v3247_v3 }
 0x379   : > { %v2278_v23 = vadd.f32 %v3105_v5, %v2149_v42  ;;  %v2269_v59 = vpop.f32.mrb[55].mxu1  ;;  %3127 = vmatmul.mubr.msk.bf16.gmra.mrb[48].mxu0 %vm1371_vm6, %v2328_v10  ;;  %v2315_v14 = vmax.f32 %v2275_v33, 0.0  ;;  %v2527_v10 = vunpack.c.l.bf16 %v3247_v3  ;;  %v2525_v45 = vunpack.c.l.bf16 %v3248_v7 }
 0x37a   : > { %v2270_v26 = vadd.f32 %v2269_v59, %v2141_v28  ;;  %v2313_v29 = vmax.f32 %v2267_v20, 0.0  ;;  %v2526_v5 = vunpack.c.h.bf16 %v3248_v7 }
 0x37b   : > { %v2316_v62 = vmax.f32 %v2278_v23, 0.0 }
 0x37c   : > { %v2314_v46 = vmax.f32 %v2270_v26, 0.0 }
 0x37d   : > { %v2330_v38 = vpack.c.bf16 %v2316_v62, %v2315_v14 }
 0x37e   : > { %v2329_v57 = vpack.c.bf16 %v2314_v46, %v2313_v29  ;;  %v3108_v2 = vpop.f32.mrb[56].mxu1 }
 0x37f   : > { %v2291_v25 = vadd.f32 %v3108_v2, %v2162_v15  ;;  %v2282_v11 = vpop.f32.mrb[57].mxu1 }
 0x380   : > { %v2283_v6 = vadd.f32 %v2282_v11, %v2154_v41  ;;  %v3109_v18 = vpop.f32.mrb[58].mxu1  ;;  %3130 = vmatprep.mubr.msk.bf16.mxu0 %vm1371_vm6, %v2329_v57 }
 0x381   : > { %v2294_v36 = vadd.f32 %v3109_v18, %v2165_v13  ;;  %v2285_v54 = vpop.f32.mrb[59].mxu1  ;;  %3131 = vmatmul.mubr.msk.bf16.gmra.mrb[52].mxu0 %vm1371_vm6, %v2330_v38  ;;  %v2319_v8 = vmax.f32 %v2291_v25, 0.0  ;;  %v3249_v25 = vld [vmem:[%s3428_s23 + $0x28] sm:$0xff]  }
 0x382   : > { %v2286_v37 = vadd.f32 %v2285_v54, %v2157_v12  ;;  %v2317_v35 = vmax.f32 %v2283_v6, 0.0  ;;  %v2531_v11 = vunpack.c.l.bf16 %v3249_v25  ;;  %v3250_v6 = vld [vmem:[%s3428_s23 + $0x20] sm:$0xff]   ;;  %v2532_v54 = vunpack.c.h.bf16 %v3249_v25 }
 0x383   : > { %v2320_v21 = vmax.f32 %v2294_v36, 0.0  ;;  %v2529_v18 = vunpack.c.l.bf16 %v3250_v6 }
 0x384   : > { %v2318_v58 = vmax.f32 %v2286_v37, 0.0 }
 0x385   : > { %v2332_v44 = vpack.c.bf16 %v2320_v21, %v2319_v8  ;;  %v2530_v21 = vunpack.c.h.bf16 %v3250_v6 }
 0x386   : > { %v2331_v31 = vpack.c.bf16 %v2318_v58, %v2317_v35 }
 0x388   : > { %3134 = vmatprep.mubr.msk.bf16.mxu0 %vm1371_vm6, %v2331_v31 }
 0x389   : > { %3135 = vmatmul.mubr.msk.bf16.gmra.mrb[56].mxu0 %vm1371_vm6, %v2332_v44 }
 0x38f   : > { %v3116_v48 = vpop.f32.mrb[36].mxu0 }
 0x390   : > { %v2435_v39 = vadd.f32 %v3116_v48, %v4651_v22  ;;  %v2426_v49 = vpop.f32.mrb[37].mxu0 }
 0x391   : > { %v2427_v52 = vadd.f32 %v4651_v22, %v2426_v49  ;;  %v3117_v24 = vpop.f32.mrb[38].mxu0 }
 0x392   : > { %v2547_v19 = vadd.f32 %v2523_v30, %v2435_v39  ;;  %v2438_v0 = vadd.f32 %v3117_v24, %v4651_v22  ;;  %v2429_v4 = vpop.f32.mrb[39].mxu0 }
 0x393   : > { %v2545_v17 = vadd.f32 %v2521_v1, %v2427_v52  ;;  %v2430_v32 = vadd.f32 %v4651_v22, %v2429_v4  ;;  %v3251_v52 = vld [vmem:[%s3428_s23 + $0x38] sm:$0xff]  }
 0x394   : > { %v2548_v51 = vadd.f32 %v2524_v61, %v2438_v0  ;;  %v2571_v47 = vmax.f32 %v2547_v19, 0.0  ;;  %v2535_v24 = vunpack.c.l.bf16 %v3251_v52  ;;  %v3252_v0 = vld [vmem:[%s3428_s23 + $0x30] sm:$0xff]  }
 0x395   : > { %v2546_v53 = vadd.f32 %v2522_v60, %v2430_v32  ;;  %v2569_v63 = vmax.f32 %v2545_v17, 0.0  ;;  %v2533_v4 = vunpack.c.l.bf16 %v3252_v0 }
 0x396   : > { %v2572_v9 = vmax.f32 %v2548_v51, 0.0  ;;  %v2536_v51 = vunpack.c.h.bf16 %v3251_v52 }
 0x397   : > { %v2570_v55 = vmax.f32 %v2546_v53, 0.0 }
 0x398   : > { %v2842_v56 = vpack.c.bf16 %v2572_v9, %v2571_v47  ;;  %v2534_v9 = vunpack.c.h.bf16 %v3252_v0 }
 0x399   : > { %v2837_v34 = vpack.c.bf16 %v2570_v55, %v2569_v63 }
 0x39a   : > { %2894 = vst [vmem:[%s4662_s18 + $0x8] sm:$0xff] %v2842_v56  }
 0x39b   : > { %2838 = vst [vmem:[%s4662_s18] sm:$0xff] %v2837_v34  }
 0x39f   : > { %v3120_v43 = vpop.f32.mrb[40].mxu0 }
 0x3a0   : > { %v2451_v40 = vadd.f32 %v3120_v43, %v4651_v22  ;;  %v2442_v33 = vpop.f32.mrb[41].mxu0 }
 0x3a1   : > { %v2443_v42 = vadd.f32 %v4651_v22, %v2442_v33  ;;  %v3121_v20 = vpop.f32.mrb[42].mxu0 }
 0x3a2   : > { %v2551_v28 = vadd.f32 %v2527_v10, %v2451_v40  ;;  %v2454_v23 = vadd.f32 %v3121_v20, %v4651_v22  ;;  %v2445_v59 = vpop.f32.mrb[43].mxu0  ;;  %v3253_v40 = vld [vmem:[%s3428_s23 + $0x48] sm:$0xff]  }
 0x3a3   : > { %v2549_v26 = vadd.f32 %v2525_v45, %v2443_v42  ;;  %v2446_v14 = vadd.f32 %v4651_v22, %v2445_v59  ;;  %v2539_v33 = vunpack.c.l.bf16 %v3253_v40 }
 0x3a4   : > { %v2552_v62 = vadd.f32 %v2528_v50, %v2454_v23  ;;  %v2575_v46 = vmax.f32 %v2551_v28, 0.0 }
 0x3a5   : > { %v2550_v29 = vadd.f32 %v2526_v5, %v2446_v14  ;;  %v2573_v15 = vmax.f32 %v2549_v26, 0.0  ;;  %v3254_v5 = vld [vmem:[%s3428_s23 + $0x40] sm:$0xff]   ;;  %v2540_v14 = vunpack.c.h.bf16 %v3253_v40 }
 0x3a6   : > { %v2576_v38 = vmax.f32 %v2552_v62, 0.0  ;;  %v2537_v28 = vunpack.c.l.bf16 %v3254_v5 }
 0x3a7   : > { %v2574_v57 = vmax.f32 %v2550_v29, 0.0 }
 0x3a8   : > { %v2852_v2 = vpack.c.bf16 %v2576_v38, %v2575_v46  ;;  %v2538_v38 = vunpack.c.h.bf16 %v3254_v5 }
 0x3a9   : > { %v2847_v41 = vpack.c.bf16 %v2574_v57, %v2573_v15 }
 0x3aa   : > { %2896 = vst [vmem:[%s4662_s18 + $0x18] sm:$0xff] %v2852_v2  }
 0x3ab   : > { %2895 = vst [vmem:[%s4662_s18 + $0x10] sm:$0xff] %v2847_v41  }
 0x3e7   : > { %v3124_v13 = vpop.f32.mrb[44].mxu0 }
 0x3e8   : > { %v2467_v12 = vadd.f32 %v3124_v13, %v4651_v22  ;;  %v2458_v36 = vpop.f32.mrb[45].mxu0 }
 0x3e9   : > { %v2459_v37 = vadd.f32 %v4651_v22, %v2458_v36  ;;  %v3125_v8 = vpop.f32.mrb[46].mxu0 }
 0x3ea   : > { %v2555_v35 = vadd.f32 %v2531_v11, %v2467_v12  ;;  %v2470_v58 = vadd.f32 %v3125_v8, %v4651_v22  ;;  %v2461_v44 = vpop.f32.mrb[47].mxu0  ;;  %v3255_v12 = vld [vmem:[%s3428_s23 + $0x58] sm:$0xff]  }
 0x3eb   : > { %v2553_v31 = vadd.f32 %v2529_v18, %v2459_v37  ;;  %v2462_v16 = vadd.f32 %v4651_v22, %v2461_v44  ;;  %v2543_v36 = vunpack.c.l.bf16 %v3255_v12 }
 0x3ec   : > { %v2556_v30 = vadd.f32 %v2532_v54, %v2470_v58  ;;  %v2579_v1 = vmax.f32 %v2555_v35, 0.0 }
 0x3ed   : > { %v2554_v27 = vadd.f32 %v2530_v21, %v2462_v16  ;;  %v2577_v39 = vmax.f32 %v2553_v31, 0.0  ;;  %v3256_v21 = vld [vmem:[%s3428_s23 + $0x50] sm:$0xff]   ;;  %v2544_v16 = vunpack.c.h.bf16 %v3255_v12  ;;  %s2905_s23 = smul.u32 1536, %s3388_s28  ;;  %s4717_s28 = scalar_lea.sflag [#allocation3], %s272_s16 }
 0x3ee   : > { %v2580_v48 = vmax.f32 %v2556_v30, 0.0  ;;  %v2541_v35 = vunpack.c.l.bf16 %v3256_v21 }
 0x3ef   : > { %v2578_v49 = vmax.f32 %v2554_v27, 0.0  ;;  %s4711_s29 = scalar_lea.hbm %s4767_s7, %s2905_s23 }
 0x3f0   : > { %v2862_v61 = vpack.c.bf16 %v2580_v48, %v2579_v1  ;;  %v2542_v48 = vunpack.c.h.bf16 %v3256_v21 }
 0x3f1   : > { %v2857_v60 = vpack.c.bf16 %v2578_v49, %v2577_v39 }
 0x3f2   : > { %2898 = vst [vmem:[%s4662_s18 + $0x28] sm:$0xff] %v2862_v61  }
 0x3f3   : > { %2897 = vst [vmem:[%s4662_s18 + $0x20] sm:$0xff] %v2857_v60  }
 0x44c   : > { %v3128_v19 = vpop.f32.mrb[48].mxu0 }
 0x44d   : > { %v2483_v17 = vadd.f32 %v3128_v19, %v4651_v22  ;;  %v2474_v32 = vpop.f32.mrb[49].mxu0 }
 0x44e   : > { %v2475_v53 = vadd.f32 %v4651_v22, %v2474_v32  ;;  %v3129_v47 = vpop.f32.mrb[50].mxu0 }
 0x44f   : > { %v2559_v63 = vadd.f32 %v2535_v24, %v2483_v17  ;;  %v2486_v55 = vadd.f32 %v3129_v47, %v4651_v22  ;;  %v2477_v56 = vpop.f32.mrb[51].mxu0 }
 0x450   : > { %v2557_v34 = vadd.f32 %v2533_v4, %v2475_v53  ;;  %v2478_v3 = vadd.f32 %v4651_v22, %v2477_v56 }
 0x451   : > { %v2560_v10 = vadd.f32 %v2536_v51, %v2486_v55  ;;  %v2583_v7 = vmax.f32 %v2559_v63, 0.0 }
 0x452   : > { %v2558_v43 = vadd.f32 %v2534_v9, %v2478_v3  ;;  %v2581_v50 = vmax.f32 %v2557_v34, 0.0 }
 0x453   : > { %v2584_v45 = vmax.f32 %v2560_v10, 0.0 }
 0x454   : > { %v2582_v42 = vmax.f32 %v2558_v43, 0.0  ;;  %v3132_v20 = vpop.f32.mrb[52].mxu0 }
 0x455   : > { %v2872_v23 = vpack.c.bf16 %v2584_v45, %v2583_v7  ;;  %v2499_v59 = vadd.f32 %v3132_v20, %v4651_v22  ;;  %v2490_v26 = vpop.f32.mrb[53].mxu0 }
 0x456   : > { %v2867_v62 = vpack.c.bf16 %v2582_v42, %v2581_v50  ;;  %v2491_v29 = vadd.f32 %v4651_v22, %v2490_v26  ;;  %v3133_v46 = vpop.f32.mrb[54].mxu0 }
 0x457   : > { %2900 = vst [vmem:[%s4662_s18 + $0x38] sm:$0xff] %v2872_v23   ;;  %v2563_v15 = vadd.f32 %v2539_v33, %v2499_v59  ;;  %v2502_v57 = vadd.f32 %v3133_v46, %v4651_v22  ;;  %v2493_v2 = vpop.f32.mrb[55].mxu0 }
 0x458   : > { %2899 = vst [vmem:[%s4662_s18 + $0x30] sm:$0xff] %v2867_v62   ;;  %v2561_v41 = vadd.f32 %v2537_v28, %v2491_v29  ;;  %v2494_v25 = vadd.f32 %v4651_v22, %v2493_v2 }
 0x459   : > { %v2564_v11 = vadd.f32 %v2540_v14, %v2502_v57  ;;  %v2587_v6 = vmax.f32 %v2563_v15, 0.0 }
 0x45a   : > { %v2562_v13 = vadd.f32 %v2538_v38, %v2494_v25  ;;  %v2585_v54 = vmax.f32 %v2561_v41, 0.0 }
 0x45b   : > { %v2588_v18 = vmax.f32 %v2564_v11, 0.0 }
 0x45c   : > { %v2586_v37 = vmax.f32 %v2562_v13, 0.0  ;;  %v3136_v8 = vpop.f32.mrb[56].mxu0 }
 0x45d   : > { %v2882_v58 = vpack.c.bf16 %v2588_v18, %v2587_v6  ;;  %v2515_v44 = vadd.f32 %v3136_v8, %v4651_v22  ;;  %v2506_v31 = vpop.f32.mrb[57].mxu0 }
 0x45e   : > { %v2877_v30 = vpack.c.bf16 %v2586_v37, %v2585_v54  ;;  %v2507_v27 = vadd.f32 %v4651_v22, %v2506_v31  ;;  %v3137_v1 = vpop.f32.mrb[58].mxu0 }
 0x45f   : > { %2902 = vst [vmem:[%s4662_s18 + $0x48] sm:$0xff] %v2882_v58   ;;  %v2567_v39 = vadd.f32 %v2543_v36, %v2515_v44  ;;  %v2518_v49 = vadd.f32 %v3137_v1, %v4651_v22  ;;  %v2509_v61 = vpop.f32.mrb[59].mxu0 }
 0x460   : > { %2901 = vst [vmem:[%s4662_s18 + $0x40] sm:$0xff] %v2877_v30   ;;  %v2565_v60 = vadd.f32 %v2541_v35, %v2507_v27  ;;  %v2510_v52 = vadd.f32 %v4651_v22, %v2509_v61 }
 0x461   : > { %v2568_v24 = vadd.f32 %v2544_v16, %v2518_v49  ;;  %v2591_v0 = vmax.f32 %v2567_v39, 0.0 }
 0x462   : > { %v2566_v19 = vadd.f32 %v2542_v48, %v2510_v52  ;;  %v2589_v17 = vmax.f32 %v2565_v60, 0.0 }
 0x463   : > { %v2592_v4 = vmax.f32 %v2568_v24, 0.0 }
 0x464   : > { %v2590_v32 = vmax.f32 %v2566_v19, 0.0 }
 0x465   : > { %v2892_v51 = vpack.c.bf16 %v2592_v4, %v2591_v0 }
 0x466   : > { %v2887_v53 = vpack.c.bf16 %v2590_v32, %v2589_v17 }
 0x467   : > { %2904 = vst [vmem:[%s4662_s18 + $0x58] sm:$0xff] %v2892_v51  }
 0x468   : > { %2903 = vst [vmem:[%s4662_s18 + $0x50] sm:$0xff] %v2887_v53  }
 0x469   : > { %3270 = shalt.err (!%p3267_p3)
}
 0x46a   : > { %s3271_s15 = scalar_lea.hbm %s4711_s29, 1536  ;;  %s3275_s18 = scalar_lea.hbm %s4767_s7, 3072 }
 0x46b   : > { %p3272_p4 = scmp.ne.s32.totalorder %s4711_s29, %s3271_s15  ;;  %p3276_p9 = scmp.lt.u32.totalorder %s4711_s29, %s4767_s7 }
 0x46c   : > { %p3277_p10 = scmp.lt.u32.totalorder %s3275_s18, %s3271_s15  ;;  %p3279_p12 = scmp.lt.u32.totalorder %s3271_s15, %s4711_s29 }
 0x46d   : > { %p3273_p7 = pnand %p3272_p4, %p3405_p5 }
 0x46e   : > { %p3278_p11 = por %p3277_p10, %p3276_p9 }
 0x46f   : > { %p3274_p8 = pneg %p3273_p7 }
 0x470   : > { %p3280_p13 = por %p3279_p12, %p3278_p11 }
 0x472   : > { %p3281_p0 = pnand %p3280_p13, %p3274_p8 }
 0x474   : > { %3284 = shalt.err (!%p3281_p0)
}
 0x475   : > { %s3326_s22 = smov 4  }
 0x476   : > { %3143 = dma.vmem_to_hbm [thread:$0]  (%p3405_p5), %s4706_s19, 1536, %s4711_s29, %s4717_s28, %s3322_s20, %s3322_s20, %s3326_s22  }
 0x477 PF: > { %p3149_p1 = scmp.ge.s32.totalorder %s3319_s27, 2  ;;  %s2671_s8 = sand.u32 1, %s3307_s24  }
 0x478   : > { %s2672_s9 = scalar_lea.sflag [#allocation3], %s2671_s8 }
 0x479   : > { %p3146_p2 = pnand %p3149_p1, %p3409_p6 }
 0x47b   : > { %3302 = dma.done.wait (!%p3146_p2), %s2672_s9, 1536  }
 0x47c   : > { %3304 = vsyncadd (!%p3146_p2), %s2672_s9, 4294965760  ;;  %p17_p3 = scmp.ge.s32.totalorder %s3392_s30, 4   ;;  %s4863_s24 = smov %s3311_s25 }
 0x47d   : > { %s4864_s25 = smov %s3315_s26  ;;  %s4865_s26 = smov %s3403_s10 }
 0x47e   : > { %s4866_s27 = smov %s3392_s30  ;;  %19 = sbr.rel (!%p17_p3) target bundleno = 3 (0x3), region = 83 }
 0x485   :  { %2677 = vsyncpa [#allocation3], 1 }
 0x486   :  { %2679 = vsyncpa [#allocation3 + $0x1], 1 }

</bundles_post_ra>
